<compile_context>
chip_gen: v7x
topology: tpu7x:2x2x1
jax: 0.10.0
libtpu: 0.0.40
codegen_flags: <defaults>
</compile_context>

<pallas_src>
import functools

import numpy as np

import jax
import jax.numpy as jnp
from jax.experimental import pallas as pl
from jax.experimental.pallas import tpu as pltpu


def _local_atten_kernel(W, Rblk, pad_left, mm_dtype,
                        x_ref, halo_ref, w1_ref, b_ref, w2_ref, o_ref,
                        ext_ref, patch_ref):
    """One (batch, row-block) tile per grid step (lane-dense layout).

    x_ref    : (1, C, L)        rows [i*Rblk, (i+1)*Rblk), L = Rblk*W lanes
    halo_ref : (1, 1, 2, C, W)  x rows (r0-1, r1) for this block (0 at edges)
    w1_ref   : (CI, C)          1x1 conv weight with BN scale folded (mm_dtype)
    b_ref    : (CI, 1)          folded BN shift (f32)
    w2_ref   : (C, 9*CI)        3x3 conv weight, im2col-folded (mm_dtype)
    o_ref    : (1, C, L)        output
    ext_ref  : (CI, Lp) VMEM    extended h: [top halo | block rows | bot halo]
    patch_ref: (9*CI, L) VMEM   im2col patch matrix scratch
    """
    L = Rblk * W
    CI = w1_ref.shape[0]
    i = pl.program_id(1)
    nb = pl.num_programs(1)

    def conv1x1_silu(v):                     # (C, n) -> (CI, n) f32
        u = jnp.dot(w1_ref[...], v.astype(mm_dtype),
                    preferred_element_type=jnp.float32) + b_ref[...]
        return u * jax.nn.sigmoid(u)

    # ---- 1x1 conv (BN scale pre-folded) + shift + SiLU, block rows ---------
    h = conv1x1_silu(x_ref[0])                                   # (CI, L)
    ext_ref[:, pad_left:pad_left + L] = h.astype(ext_ref.dtype)

    # ---- 1-row halos (global rows r0-1 and r1).  Rows outside the image must
    # contribute zero: the 3x3 zero-padding pads h, not x, so mask post-conv.
    h_top = conv1x1_silu(halo_ref[0, 0, 0])                      # (CI, W)
    h_bot = conv1x1_silu(halo_ref[0, 0, 1])                      # (CI, W)
    h_top = jnp.where(i > 0, h_top, 0.0)
    h_bot = jnp.where(i < nb - 1, h_bot, 0.0)
    ext_ref[:, pad_left - W:pad_left] = h_top.astype(ext_ref.dtype)
    ext_ref[:, pad_left + L:pad_left + L + W] = h_bot.astype(ext_ref.dtype)

    # ---- hoisted column masks (the only masks needed; row boundaries are
    # covered by the halo rows written into ext_ref) --------------------------
    col = jax.lax.broadcasted_iota(jnp.int32, (1, L), 1) % W
    left_ok = col >= 1            # lanes valid for dx == -1
    right_ok = col <= W - 2       # lanes valid for dx == +1

    # ---- im2col: nine statically-offset window loads from ext_ref ----------
    for ky in range(3):
        for kx in range(3):
            dy, dx, tap = ky - 1, kx - 1, ky * 3 + kx
            start = pad_left + dy * W + dx
            win = ext_ref[:, start:start + L]                    # (CI, L)
            if dx == -1:
                win = jnp.where(left_ok, win, 0)
            elif dx == 1:
                win = jnp.where(right_ok, win, 0)
            patch_ref[tap * CI:(tap + 1) * CI, :] = win.astype(patch_ref.dtype)

    # ---- single fused 3x3 conv matmul (K = 9*CI) ----------------------------
    acc = jnp.dot(w2_ref[...], patch_ref[...],
                  preferred_element_type=jnp.float32)            # (C, L) f32

    # ---- tanh spatial gate + residual (x re-read, f32, lane-dense store) ----
    o_ref[0] = (x_ref[0] * (jnp.tanh(acc) + 1.0)).astype(o_ref.dtype)


def _choose_row_block(H, W, C, itemsize=4, target_bytes=2 << 20):
    """Largest row block dividing H, with lanes a multiple of 128, bounding the
    per-step (double-buffered) x/out block size."""
    divs = [d for d in range(1, H + 1) if H % d == 0 and (d * W) % 128 == 0]
    if not divs:
        assert (H * W) % 128 == 0, "H*W must be a multiple of 128 (lane-dense)"
        return H
    fit = [d for d in divs if C * d * W * itemsize <= target_bytes]
    return max(fit) if fit else min(divs)


def local_atten_forward(x_nchw, w1_oihw, bn_scale, bn_shift, w2_oihw,
                        *, matmul_dtype=jnp.bfloat16, row_block=None):
    """x_nchw: (N, C, H, W); w1_oihw: (CI, C, 1, 1); w2_oihw: (C, CI, 3, 3)."""
    N, C, H, W = x_nchw.shape
    CI = w1_oihw.shape[0]
    HW = H * W

    if row_block is None:
        row_block = _choose_row_block(H, W, C, x_nchw.dtype.itemsize)
    Rblk = int(row_block)
    assert H % Rblk == 0, "row_block must divide H"
    nb = H // Rblk
    BLK = Rblk * W
    assert BLK % 128 == 0, "row_block * W must be a multiple of 128 (lane-dense)"
    sub = (8 * 4) // np.dtype(matmul_dtype).itemsize
    assert CI % sub == 0, "inter_channels must be a multiple of the sublane tile"
    assert C % 8 == 0, "in_channels must be a multiple of 8"

    # extended-h scratch geometry (halo rows sit just left/right of the block)
    pad_left = ((W + 1 + 127) // 128) * 128
    Lp = ((pad_left + BLK + W + 1 + 127) // 128) * 128

    # NCHW -> (N, C, HW): pure reshape; channels on sublanes, HW on lanes.
    x3 = x_nchw.reshape(N, C, HW)

    # Per-block 1-row halos (global rows r0-1 and r1), zeros at image edges,
    # so x blocks never overlap and x itself is read from HBM exactly once.
    xp = jnp.pad(x_nchw, ((0, 0), (0, 0), (1, 1), (0, 0)))       # (N, C, H+2, W)
    top = xp[:, :, 0:H:Rblk, :]                                  # (N, C, nb, W)
    bot = xp[:, :, Rblk + 1::Rblk, :]                            # (N, C, nb, W)
    halo = jnp.stack([top, bot], axis=2)                         # (N, C, 2, nb, W)
    halo = jnp.transpose(halo, (0, 3, 2, 1, 4))                  # (N, nb, 2, C, W)

    # Fold BN scale into the 1x1 weight in f32; cast to the MXU dtype after.
    w1s = (w1_oihw[:, :, 0, 0].astype(jnp.float32)
           * bn_scale.astype(jnp.float32)[:, None]).astype(matmul_dtype)
    bias = bn_shift.astype(jnp.float32).reshape(CI, 1)

    # im2col-folded 3x3 weight: (C, 9*CI) with K index = (ky*3+kx)*CI + ci.
    w2m = jnp.transpose(w2_oihw, (0, 2, 3, 1)).reshape(C, 9 * CI)
    w2m = w2m.astype(matmul_dtype)

    kernel = functools.partial(_local_atten_kernel, W, Rblk, pad_left,
                               matmul_dtype)

    out3 = pl.pallas_call(
        kernel,
        out_shape=jax.ShapeDtypeStruct((N, C, HW), x_nchw.dtype),
        grid_spec=pltpu.PrefetchScalarGridSpec(
            num_scalar_prefetch=0,
            grid=(N, nb),
            in_specs=[
                pl.BlockSpec((1, C, BLK), lambda n, i: (n, 0, i)),        # x
                pl.BlockSpec((1, 1, 2, C, W), lambda n, i: (n, i, 0, 0, 0)),  # halo
                pl.BlockSpec((CI, C), lambda n, i: (0, 0)),               # w1*scale
                pl.BlockSpec((CI, 1), lambda n, i: (0, 0)),               # bn shift
                pl.BlockSpec((C, 9 * CI), lambda n, i: (0, 0)),           # w2 im2col
            ],
            out_specs=pl.BlockSpec((1, C, BLK), lambda n, i: (n, 0, i)),
            scratch_shapes=[
                pltpu.VMEM((CI, Lp), matmul_dtype),        # extended h
                pltpu.VMEM((9 * CI, BLK), matmul_dtype),   # im2col patch
            ],
        ),
        compiler_params=pltpu.CompilerParams(
            dimension_semantics=("parallel", "parallel"),
            vmem_limit_bytes=64 * 1024 * 1024),
    )(x3, halo, w1s, bias, w2m)

    return out3.reshape(N, C, H, W)


def local_atten_reference(x, w1_oihw, bn_scale, bn_shift, w2_oihw):
    """Pure-JAX/XLA reference using real convolutions (f32, HIGHEST precision)."""
    hi = jax.lax.Precision.HIGHEST
    dn = ('NCHW', 'OIHW', 'NCHW')
    h = jax.lax.conv_general_dilated(x, w1_oihw, (1, 1), 'VALID',
                                     dimension_numbers=dn, precision=hi)
    h = h * bn_scale[None, :, None, None] + bn_shift[None, :, None, None]
    h = h * jax.nn.sigmoid(h)
    m = jax.lax.conv_general_dilated(h, w2_oihw, (1, 1), 'SAME',
                                     dimension_numbers=dn, precision=hi)
    mask = jnp.tanh(m)
    return x * mask + x


if __name__ == "__main__":
    # Small, module-consistent shapes (scaled-down 256/32 -> 64/16 channels).
    N, C_IN, C_INTER, H, W = 2, 64, 16, 16, 16

    key = jax.random.PRNGKey(0)
    k1, k2, kx, kg, kb, km, kv = jax.random.split(key, 7)

    # Deterministic xavier-normal-style weights (PyTorch OIHW layouts).
    std1 = (2.0 / (C_IN + C_INTER)) ** 0.5
    w1 = (std1 * jax.random.normal(k1, (C_INTER, C_IN, 1, 1))).astype(jnp.float32)
    std2 = (2.0 / ((C_INTER + C_IN) * 9)) ** 0.5
    w2 = (std2 * jax.random.normal(k2, (C_IN, C_INTER, 3, 3))).astype(jnp.float32)

    # Eval-mode BatchNorm folded into an affine; use non-trivial statistics so
    # BN folding and the "zero-pad h, not x" halo semantics are exercised.
    eps = 1e-5
    gamma = 1.0 + 0.1 * jax.random.normal(kg, (C_INTER,), jnp.float32)
    beta = 0.1 * jax.random.normal(kb, (C_INTER,), jnp.float32)
    r_mean = 0.05 * jax.random.normal(km, (C_INTER,), jnp.float32)
    r_var = jnp.abs(1.0 + 0.1 * jax.random.normal(kv, (C_INTER,), jnp.float32))
    bn_scale = gamma / jnp.sqrt(r_var + eps)
    bn_shift = beta - r_mean * bn_scale

    x = jax.random.normal(kx, (N, C_IN, H, W), jnp.float32)

    ref = jax.block_until_ready(
        local_atten_reference(x, w1, bn_scale, bn_shift, w2))

    # f32 MXU path with spatial row blocking forced on (2 blocks per image):
    # tight check of the window/mask im2col, halo stitching and BN folding.
    out_a = jax.block_until_ready(
        local_atten_forward(x, w1, bn_scale, bn_shift, w2,
                            matmul_dtype=jnp.float32, row_block=8))
    assert out_a.shape == x.shape and out_a.dtype == x.dtype
    err_a = float(jnp.max(jnp.abs(out_a - ref)))
    assert jnp.allclose(out_a, ref, rtol=1e-3, atol=1e-3), (
        "f32/row_block=8 max abs err = %g" % err_a)

    # f32, auto row block (whole image per step): halo-fully-masked path.
    out_b = jax.block_until_ready(
        local_atten_forward(x, w1, bn_scale, bn_shift, w2,
                            matmul_dtype=jnp.float32))
    err_b = float(jnp.max(jnp.abs(out_b - ref)))
    assert jnp.allclose(out_b, ref, rtol=1e-3, atol=1e-3), (
        "f32/auto max abs err = %g" % err_b)

    # Default configuration: bf16 MXU inputs + bf16 scratch, f32 accumulation
    # and residual (looser tolerance by construction of bf16).
    out_c = jax.block_until_ready(
        local_atten_forward(x, w1, bn_scale, bn_shift, w2, row_block=8))
    err_c = float(jnp.max(jnp.abs(out_c - ref)))
    assert jnp.allclose(out_c, ref, rtol=1e-1, atol=1e-1), (
        "bf16 default max abs err = %g" % err_c)

    print("KERNEL_OK")
</pallas_src>

<mosaic_0001>
module attributes {stable_mosaic.version = 11 : i64} {
  func.func @_local_atten_kernel(%arg0: i32, %arg1: i32, %arg2: memref<1x64x128xf32, #tpu.memory_space<vmem>>, %arg3: memref<1x1x2x64x16xf32, #tpu.memory_space<vmem>>, %arg4: memref<16x64xf32, #tpu.memory_space<vmem>>, %arg5: memref<16x1xf32, #tpu.memory_space<vmem>>, %arg6: memref<64x144xf32, #tpu.memory_space<vmem>>, %arg7: memref<1x64x128xf32, #tpu.memory_space<vmem>>, %arg8: memref<16x384xf32, #tpu.memory_space<vmem>>, %arg9: memref<144x128xf32, #tpu.memory_space<vmem>>) attributes {dimension_semantics = [#tpu.dimension_semantics<parallel>, #tpu.dimension_semantics<parallel>], iteration_bounds = array<i64: 2, 2>, scalar_prefetch = 0 : i64, scratch_operands = 2 : i64, tpu.core_type = #tpu.core_type<tc>, window_params = [{transform_indices = @transform_0, window_bounds = array<i64: 1, 64, 128>}, {transform_indices = @transform_1, window_bounds = array<i64: 1, 1, 2, 64, 16>}, {pipeline_mode = #tpu.pipeline_mode<synchronous>, transform_indices = @transform_2, window_bounds = array<i64: 16, 64>}, {pipeline_mode = #tpu.pipeline_mode<synchronous>, transform_indices = @transform_3, window_bounds = array<i64: 16, 1>}, {pipeline_mode = #tpu.pipeline_mode<synchronous>, transform_indices = @transform_4, window_bounds = array<i64: 64, 144>}, {transform_indices = @transform_5, window_bounds = array<i64: 1, 64, 128>}]} {
    %c0 = arith.constant 0 : index
    %c0_0 = arith.constant 0 : index
    %c0_1 = arith.constant 0 : index
    %0 = vector.load %arg2[%c0, %c0_0, %c0_1] : memref<1x64x128xf32, #tpu.memory_space<vmem>>, vector<1x64x128xf32>
    %1 = vector.shape_cast %0 : vector<1x64x128xf32> to vector<64x128xf32>
    %c0_2 = arith.constant 0 : index
    %c0_3 = arith.constant 0 : index
    %2 = vector.load %arg4[%c0_2, %c0_3] : memref<16x64xf32, #tpu.memory_space<vmem>>, vector<16x64xf32>
    %cst = arith.constant dense<0.000000e+00> : vector<16x128xf32>
    %3 = tpu.matmul %2, %1, %cst {dimension_numbers = #tpu.dot_dimension_numbers<[1], [0], [0], [1], [0, 0, 1, 1], [], []>} : vector<16x64xf32>, vector<64x128xf32>, vector<16x128xf32> -> vector<16x128xf32>
    %c0_4 = arith.constant 0 : index
    %c0_5 = arith.constant 0 : index
    %4 = vector.load %arg5[%c0_4, %c0_5] : memref<16x1xf32, #tpu.memory_space<vmem>>, vector<16x1xf32>
    %5 = vector.broadcast %4 : vector<16x1xf32> to vector<16x128xf32>
    %6 = arith.addf %3, %5 : vector<16x128xf32>
    %7 = arith.negf %6 : vector<16x128xf32>
    %8 = math.exp %7 : vector<16x128xf32>
    %cst_6 = arith.constant 1.000000e+00 : f32
    %9 = vector.broadcast %cst_6 : f32 to vector<16x128xf32>
    %10 = arith.addf %9, %8 : vector<16x128xf32>
    %11 = arith.divf %9, %10 : vector<16x128xf32>
    %12 = arith.mulf %6, %11 : vector<16x128xf32>
    %c0_7 = arith.constant 0 : index
    %c128 = arith.constant 128 : index
    %13 = vector.load %arg8[%c0_7, %c128] : memref<16x384xf32, #tpu.memory_space<vmem>>, vector<16x128xf32>
    tpu.vector_store %arg8[%c0_7, %c128], %12 {strides = array<i32>} : memref<16x384xf32, #tpu.memory_space<vmem>>, vector<16x128xf32>,
    %c0_8 = arith.constant 0 : index
    %c0_9 = arith.constant 0 : index
    %c0_10 = arith.constant 0 : index
    %c0_11 = arith.constant 0 : index
    %c0_12 = arith.constant 0 : index
    %14 = vector.load %arg3[%c0_8, %c0_9, %c0_10, %c0_11, %c0_12] : memref<1x1x2x64x16xf32, #tpu.memory_space<vmem>>, vector<1x1x1x64x16xf32>
    %15 = vector.shape_cast %14 : vector<1x1x1x64x16xf32> to vector<64x16xf32>
    %c0_13 = arith.constant 0 : index
    %c0_14 = arith.constant 0 : index
    %16 = vector.load %arg4[%c0_13, %c0_14] : memref<16x64xf32, #tpu.memory_space<vmem>>, vector<16x64xf32>
    %cst_15 = arith.constant dense<0.000000e+00> : vector<16x16xf32>
    %17 = tpu.matmul %16, %15, %cst_15 {dimension_numbers = #tpu.dot_dimension_numbers<[1], [0], [0], [1], [0, 0, 1, 1], [], []>} : vector<16x64xf32>, vector<64x16xf32>, vector<16x16xf32> -> vector<16x16xf32>
    %c0_16 = arith.constant 0 : index
    %c0_17 = arith.constant 0 : index
    %18 = vector.load %arg5[%c0_16, %c0_17] : memref<16x1xf32, #tpu.memory_space<vmem>>, vector<16x1xf32>
    %19 = vector.broadcast %18 : vector<16x1xf32> to vector<16x16xf32>
    %20 = arith.addf %17, %19 : vector<16x16xf32>
    %21 = arith.negf %20 : vector<16x16xf32>
    %22 = math.exp %21 : vector<16x16xf32>
    %cst_18 = arith.constant 1.000000e+00 : f32
    %23 = vector.broadcast %cst_18 : f32 to vector<16x16xf32>
    %24 = arith.addf %23, %22 : vector<16x16xf32>
    %25 = arith.divf %23, %24 : vector<16x16xf32>
    %26 = arith.mulf %20, %25 : vector<16x16xf32>
    %c0_19 = arith.constant 0 : index
    %c0_20 = arith.constant 0 : index
    %c1 = arith.constant 1 : index
    %c0_21 = arith.constant 0 : index
    %c0_22 = arith.constant 0 : index
    %27 = vector.load %arg3[%c0_19, %c0_20, %c1, %c0_21, %c0_22] : memref<1x1x2x64x16xf32, #tpu.memory_space<vmem>>, vector<1x1x1x64x16xf32>
    %28 = vector.shape_cast %27 : vector<1x1x1x64x16xf32> to vector<64x16xf32>
    %c0_23 = arith.constant 0 : index
    %c0_24 = arith.constant 0 : index
    %29 = vector.load %arg4[%c0_23, %c0_24] : memref<16x64xf32, #tpu.memory_space<vmem>>, vector<16x64xf32>
    %cst_25 = arith.constant dense<0.000000e+00> : vector<16x16xf32>
    %30 = tpu.matmul %29, %28, %cst_25 {dimension_numbers = #tpu.dot_dimension_numbers<[1], [0], [0], [1], [0, 0, 1, 1], [], []>} : vector<16x64xf32>, vector<64x16xf32>, vector<16x16xf32> -> vector<16x16xf32>
    %c0_26 = arith.constant 0 : index
    %c0_27 = arith.constant 0 : index
    %31 = vector.load %arg5[%c0_26, %c0_27] : memref<16x1xf32, #tpu.memory_space<vmem>>, vector<16x1xf32>
    %32 = vector.broadcast %31 : vector<16x1xf32> to vector<16x16xf32>
    %33 = arith.addf %30, %32 : vector<16x16xf32>
    %34 = arith.negf %33 : vector<16x16xf32>
    %35 = math.exp %34 : vector<16x16xf32>
    %cst_28 = arith.constant 1.000000e+00 : f32
    %36 = vector.broadcast %cst_28 : f32 to vector<16x16xf32>
    %37 = arith.addf %36, %35 : vector<16x16xf32>
    %38 = arith.divf %36, %37 : vector<16x16xf32>
    %39 = arith.mulf %33, %38 : vector<16x16xf32>
    %c0_i32 = arith.constant 0 : i32
    %40 = arith.cmpi sgt, %arg1, %c0_i32 : i32
    %cst_29 = arith.constant 0.000000e+00 : f32
    %41 = vector.broadcast %cst_29 : f32 to vector<16x16xf32>
    %42 = arith.select %40, %26, %41 : vector<16x16xf32>
    %c1_i32 = arith.constant 1 : i32
    %43 = arith.cmpi slt, %arg1, %c1_i32 : i32
    %cst_30 = arith.constant 0.000000e+00 : f32
    %44 = vector.broadcast %cst_30 : f32 to vector<16x16xf32>
    %45 = arith.select %43, %39, %44 : vector<16x16xf32>
    %c0_31 = arith.constant 0 : index
    %c112 = arith.constant 112 : index
    %46 = vector.load %arg8[%c0_31, %c112] : memref<16x384xf32, #tpu.memory_space<vmem>>, vector<16x16xf32>
    tpu.vector_store %arg8[%c0_31, %c112], %42 {strides = array<i32>} : memref<16x384xf32, #tpu.memory_space<vmem>>, vector<16x16xf32>,
    %c0_32 = arith.constant 0 : index
    %c256 = arith.constant 256 : index
    %47 = vector.load %arg8[%c0_32, %c256] : memref<16x384xf32, #tpu.memory_space<vmem>>, vector<16x16xf32>
    tpu.vector_store %arg8[%c0_32, %c256], %45 {strides = array<i32>} : memref<16x384xf32, #tpu.memory_space<vmem>>, vector<16x16xf32>,
    %48 = tpu.iota {dimensions = array<i32: 1>} : vector<1x128xi32>
    %c16_i32 = arith.constant 16 : i32
    %c0_i32_33 = arith.constant 0 : i32
    %49 = arith.cmpi eq, %c16_i32, %c0_i32_33 : i32
    %c1_i32_34 = arith.constant 1 : i32
    %50 = arith.select %49, %c1_i32_34, %c16_i32 : i32
    %51 = vector.broadcast %50 : i32 to vector<1x128xi32>
    %52 = arith.remsi %48, %51 : vector<1x128xi32>
    %c0_i32_35 = arith.constant 0 : i32
    %53 = vector.broadcast %c0_i32_35 : i32 to vector<1x128xi32>
    %54 = arith.cmpi ne, %52, %53 : vector<1x128xi32>
    %c0_i32_36 = arith.constant 0 : i32
    %55 = vector.broadcast %c0_i32_36 : i32 to vector<1x128xi32>
    %56 = arith.cmpi slt, %52, %55 : vector<1x128xi32>
    %c0_i32_37 = arith.constant 0 : i32
    %57 = arith.cmpi slt, %50, %c0_i32_37 : i32
    %58 = vector.broadcast %57 : i1 to vector<1x128xi1>
    %59 = vector.broadcast %58 : vector<1x128xi1> to vector<1x128xi1>
    %60 = arith.xori %56, %59 : vector<1x128xi1>
    %61 = arith.andi %60, %54 : vector<1x128xi1>
    %62 = vector.broadcast %50 : i32 to vector<1x128xi32>
    %63 = arith.addi %52, %62 : vector<1x128xi32>
    %64 = arith.select %61, %63, %52 : vector<1x128xi1>, vector<1x128xi32>
    %c1_i32_38 = arith.constant 1 : i32
    %65 = vector.broadcast %c1_i32_38 : i32 to vector<1x128xi32>
    %66 = arith.cmpi sge, %64, %65 : vector<1x128xi32>
    %c14_i32 = arith.constant 14 : i32
    %67 = vector.broadcast %c14_i32 : i32 to vector<1x128xi32>
    %68 = arith.cmpi sle, %64, %67 : vector<1x128xi32>
    %c0_39 = arith.constant 0 : index
    %c111 = arith.constant 111 : index
    %69 = vector.load %arg8[%c0_39, %c111] : memref<16x384xf32, #tpu.memory_space<vmem>>, vector<16x128xf32>
    %c0_i32_40 = arith.constant 0 : i32
    %70 = arith.sitofp %c0_i32_40 : i32 to f32
    %71 = vector.shape_cast %66 : vector<1x128xi1> to vector<1x128xi1>
    %72 = vector.broadcast %71 : vector<1x128xi1> to vector<16x128xi1>
    %73 = vector.broadcast %70 : f32 to vector<16x128xf32>
    %74 = arith.select %72, %69, %73 : vector<16x128xi1>, vector<16x128xf32>
    %c0_41 = arith.constant 0 : index
    %c0_42 = arith.constant 0 : index
    %75 = vector.load %arg9[%c0_41, %c0_42] : memref<144x128xf32, #tpu.memory_space<vmem>>, vector<16x128xf32>
    tpu.vector_store %arg9[%c0_41, %c0_42], %74 {strides = array<i32>} : memref<144x128xf32, #tpu.memory_space<vmem>>, vector<16x128xf32>,
    %c0_43 = arith.constant 0 : index
    %c112_44 = arith.constant 112 : index
    %76 = vector.load %arg8[%c0_43, %c112_44] : memref<16x384xf32, #tpu.memory_space<vmem>>, vector<16x128xf32>
    %c16 = arith.constant 16 : index
    %c0_45 = arith.constant 0 : index
    %77 = vector.load %arg9[%c16, %c0_45] : memref<144x128xf32, #tpu.memory_space<vmem>>, vector<16x128xf32>
    tpu.vector_store %arg9[%c16, %c0_45], %76 {strides = array<i32>} : memref<144x128xf32, #tpu.memory_space<vmem>>, vector<16x128xf32>,
    %c0_46 = arith.constant 0 : index
    %c113 = arith.constant 113 : index
    %78 = vector.load %arg8[%c0_46, %c113] : memref<16x384xf32, #tpu.memory_space<vmem>>, vector<16x128xf32>
    %c0_i32_47 = arith.constant 0 : i32
    %79 = arith.sitofp %c0_i32_47 : i32 to f32
    %80 = vector.shape_cast %68 : vector<1x128xi1> to vector<1x128xi1>
    %81 = vector.broadcast %80 : vector<1x128xi1> to vector<16x128xi1>
    %82 = vector.broadcast %79 : f32 to vector<16x128xf32>
    %83 = arith.select %81, %78, %82 : vector<16x128xi1>, vector<16x128xf32>
    %c32 = arith.constant 32 : index
    %c0_48 = arith.constant 0 : index
    %84 = vector.load %arg9[%c32, %c0_48] : memref<144x128xf32, #tpu.memory_space<vmem>>, vector<16x128xf32>
    tpu.vector_store %arg9[%c32, %c0_48], %83 {strides = array<i32>} : memref<144x128xf32, #tpu.memory_space<vmem>>, vector<16x128xf32>,
    %c0_49 = arith.constant 0 : index
    %c127 = arith.constant 127 : index
    %85 = vector.load %arg8[%c0_49, %c127] : memref<16x384xf32, #tpu.memory_space<vmem>>, vector<16x128xf32>
    %c0_i32_50 = arith.constant 0 : i32
    %86 = arith.sitofp %c0_i32_50 : i32 to f32
    %87 = vector.shape_cast %66 : vector<1x128xi1> to vector<1x128xi1>
    %88 = vector.broadcast %87 : vector<1x128xi1> to vector<16x128xi1>
    %89 = vector.broadcast %86 : f32 to vector<16x128xf32>
    %90 = arith.select %88, %85, %89 : vector<16x128xi1>, vector<16x128xf32>
    %c48 = arith.constant 48 : index
    %c0_51 = arith.constant 0 : index
    %91 = vector.load %arg9[%c48, %c0_51] : memref<144x128xf32, #tpu.memory_space<vmem>>, vector<16x128xf32>
    tpu.vector_store %arg9[%c48, %c0_51], %90 {strides = array<i32>} : memref<144x128xf32, #tpu.memory_space<vmem>>, vector<16x128xf32>,
    %c0_52 = arith.constant 0 : index
    %c128_53 = arith.constant 128 : index
    %92 = vector.load %arg8[%c0_52, %c128_53] : memref<16x384xf32, #tpu.memory_space<vmem>>, vector<16x128xf32>
    %c64 = arith.constant 64 : index
    %c0_54 = arith.constant 0 : index
    %93 = vector.load %arg9[%c64, %c0_54] : memref<144x128xf32, #tpu.memory_space<vmem>>, vector<16x128xf32>
    tpu.vector_store %arg9[%c64, %c0_54], %92 {strides = array<i32>} : memref<144x128xf32, #tpu.memory_space<vmem>>, vector<16x128xf32>,
    %c0_55 = arith.constant 0 : index
    %c129 = arith.constant 129 : index
    %94 = vector.load %arg8[%c0_55, %c129] : memref<16x384xf32, #tpu.memory_space<vmem>>, vector<16x128xf32>
    %c0_i32_56 = arith.constant 0 : i32
    %95 = arith.sitofp %c0_i32_56 : i32 to f32
    %96 = vector.shape_cast %68 : vector<1x128xi1> to vector<1x128xi1>
    %97 = vector.broadcast %96 : vector<1x128xi1> to vector<16x128xi1>
    %98 = vector.broadcast %95 : f32 to vector<16x128xf32>
    %99 = arith.select %97, %94, %98 : vector<16x128xi1>, vector<16x128xf32>
    %c80 = arith.constant 80 : index
    %c0_57 = arith.constant 0 : index
    %100 = vector.load %arg9[%c80, %c0_57] : memref<144x128xf32, #tpu.memory_space<vmem>>, vector<16x128xf32>
    tpu.vector_store %arg9[%c80, %c0_57], %99 {strides = array<i32>} : memref<144x128xf32, #tpu.memory_space<vmem>>, vector<16x128xf32>,
    %c0_58 = arith.constant 0 : index
    %c143 = arith.constant 143 : index
    %101 = vector.load %arg8[%c0_58, %c143] : memref<16x384xf32, #tpu.memory_space<vmem>>, vector<16x128xf32>
    %c0_i32_59 = arith.constant 0 : i32
    %102 = arith.sitofp %c0_i32_59 : i32 to f32
    %103 = vector.shape_cast %66 : vector<1x128xi1> to vector<1x128xi1>
    %104 = vector.broadcast %103 : vector<1x128xi1> to vector<16x128xi1>
    %105 = vector.broadcast %102 : f32 to vector<16x128xf32>
    %106 = arith.select %104, %101, %105 : vector<16x128xi1>, vector<16x128xf32>
    %c96 = arith.constant 96 : index
    %c0_60 = arith.constant 0 : index
    %107 = vector.load %arg9[%c96, %c0_60] : memref<144x128xf32, #tpu.memory_space<vmem>>, vector<16x128xf32>
    tpu.vector_store %arg9[%c96, %c0_60], %106 {strides = array<i32>} : memref<144x128xf32, #tpu.memory_space<vmem>>, vector<16x128xf32>,
    %c0_61 = arith.constant 0 : index
    %c144 = arith.constant 144 : index
    %108 = vector.load %arg8[%c0_61, %c144] : memref<16x384xf32, #tpu.memory_space<vmem>>, vector<16x128xf32>
    %c112_62 = arith.constant 112 : index
    %c0_63 = arith.constant 0 : index
    %109 = vector.load %arg9[%c112_62, %c0_63] : memref<144x128xf32, #tpu.memory_space<vmem>>, vector<16x128xf32>
    tpu.vector_store %arg9[%c112_62, %c0_63], %108 {strides = array<i32>} : memref<144x128xf32, #tpu.memory_space<vmem>>, vector<16x128xf32>,
    %c0_64 = arith.constant 0 : index
    %c145 = arith.constant 145 : index
    %110 = vector.load %arg8[%c0_64, %c145] : memref<16x384xf32, #tpu.memory_space<vmem>>, vector<16x128xf32>
    %c0_i32_65 = arith.constant 0 : i32
    %111 = arith.sitofp %c0_i32_65 : i32 to f32
    %112 = vector.shape_cast %68 : vector<1x128xi1> to vector<1x128xi1>
    %113 = vector.broadcast %112 : vector<1x128xi1> to vector<16x128xi1>
    %114 = vector.broadcast %111 : f32 to vector<16x128xf32>
    %115 = arith.select %113, %110, %114 : vector<16x128xi1>, vector<16x128xf32>
    %c128_66 = arith.constant 128 : index
    %c0_67 = arith.constant 0 : index
    %116 = vector.load %arg9[%c128_66, %c0_67] : memref<144x128xf32, #tpu.memory_space<vmem>>, vector<16x128xf32>
    tpu.vector_store %arg9[%c128_66, %c0_67], %115 {strides = array<i32>} : memref<144x128xf32, #tpu.memory_space<vmem>>, vector<16x128xf32>,
    %c0_68 = arith.constant 0 : index
    %c0_69 = arith.constant 0 : index
    %117 = vector.load %arg6[%c0_68, %c0_69] : memref<64x144xf32, #tpu.memory_space<vmem>>, vector<64x144xf32>
    %c0_70 = arith.constant 0 : index
    %c0_71 = arith.constant 0 : index
    %118 = vector.load %arg9[%c0_70, %c0_71] : memref<144x128xf32, #tpu.memory_space<vmem>>, vector<144x128xf32>
    %cst_72 = arith.constant dense<0.000000e+00> : vector<64x128xf32>
    %119 = tpu.matmul %117, %118, %cst_72 {dimension_numbers = #tpu.dot_dimension_numbers<[1], [0], [0], [1], [0, 0, 1, 1], [], []>} : vector<64x144xf32>, vector<144x128xf32>, vector<64x128xf32> -> vector<64x128xf32>
    %c0_73 = arith.constant 0 : index
    %c0_74 = arith.constant 0 : index
    %c0_75 = arith.constant 0 : index
    %120 = vector.load %arg2[%c0_73, %c0_74, %c0_75] : memref<1x64x128xf32, #tpu.memory_space<vmem>>, vector<1x64x128xf32>
    %121 = vector.shape_cast %120 : vector<1x64x128xf32> to vector<64x128xf32>
    %122 = math.tanh %119 : vector<64x128xf32>
    %cst_76 = arith.constant 1.000000e+00 : f32
    %123 = vector.broadcast %cst_76 : f32 to vector<64x128xf32>
    %124 = arith.addf %122, %123 : vector<64x128xf32>
    %125 = arith.mulf %121, %124 : vector<64x128xf32>
    %c0_77 = arith.constant 0 : index
    %c0_78 = arith.constant 0 : index
    %c0_79 = arith.constant 0 : index
    %126 = vector.load %arg7[%c0_77, %c0_78, %c0_79] : memref<1x64x128xf32, #tpu.memory_space<vmem>>, vector<1x64x128xf32>
    %127 = vector.shape_cast %126 : vector<1x64x128xf32> to vector<64x128xf32>
    %128 = vector.shape_cast %125 : vector<64x128xf32> to vector<1x64x128xf32>
    tpu.vector_store %arg7[%c0_77, %c0_78, %c0_79], %128 {strides = array<i32>} : memref<1x64x128xf32, #tpu.memory_space<vmem>>, vector<1x64x128xf32>,
    return
  }
  func.func @transform_0(%arg0: i32, %arg1: i32) -> (i32, i32, i32) {
    %c0_i32 = arith.constant 0 : i32
    %c0_i32_0 = arith.constant 0 : i32
    return %arg0, %c0_i32, %arg1 : i32, i32, i32
  }
  func.func @transform_1(%arg0: i32, %arg1: i32) -> (i32, i32, i32, i32, i32) {
    %c0_i32 = arith.constant 0 : i32
    %c0_i32_0 = arith.constant 0 : i32
    %c0_i32_1 = arith.constant 0 : i32
    %c0_i32_2 = arith.constant 0 : i32
    return %arg0, %arg1, %c0_i32, %c0_i32_0, %c0_i32_1 : i32, i32, i32, i32, i32
  }
  func.func @transform_2(%arg0: i32, %arg1: i32) -> (i32, i32) {
    %c0_i32 = arith.constant 0 : i32
    %c0_i32_0 = arith.constant 0 : i32
    %c0_i32_1 = arith.constant 0 : i32
    return %c0_i32, %c0_i32_0 : i32, i32
  }
  func.func @transform_3(%arg0: i32, %arg1: i32) -> (i32, i32) {
    %c0_i32 = arith.constant 0 : i32
    %c0_i32_0 = arith.constant 0 : i32
    %c0_i32_1 = arith.constant 0 : i32
    return %c0_i32, %c0_i32_0 : i32, i32
  }
  func.func @transform_4(%arg0: i32, %arg1: i32) -> (i32, i32) {
    %c0_i32 = arith.constant 0 : i32
    %c0_i32_0 = arith.constant 0 : i32
    %c0_i32_1 = arith.constant 0 : i32
    return %c0_i32, %c0_i32_0 : i32, i32
  }
  func.func @transform_5(%arg0: i32, %arg1: i32) -> (i32, i32, i32) {
    %c0_i32 = arith.constant 0 : i32
    %c0_i32_0 = arith.constant 0 : i32
    return %arg0, %c0_i32, %arg1 : i32, i32, i32
  }
}

</mosaic_0001>

<bundles_post_ra>
// kernel: tpu_custom_call.1
= control target key start
LH: loop header
LB: loop body
LE: loop exit
PB: predicated region body
PF: predicated region fallthrough
CT: control target
= control target key end

     0   :  { %s2587_s0 = inlined_call_operand.hbm [shape: f32[2,64,256], index: 0, kind: input, shape index: {}]   ;;  %s2588_s1 = inlined_call_operand.hbm [shape: f32[2,2,2,64,16], index: 1, kind: input, shape index: {}]   ;;  %s2589_s2 = inlined_call_operand.hbm [shape: f32[16,64], index: 2, kind: input, shape index: {}]   ;;  %s2590_s3 = inlined_call_operand.hbm [shape: f32[16,1], index: 3, kind: input, shape index: {}]   ;;  %s2591_s4 = inlined_call_operand.hbm [shape: f32[64,144], index: 4, kind: input, shape index: {}]   ;;  %s2592_s5 = inlined_call_operand.hbm [shape: f32[2,64,256], index: 5, kind: output, shape index: {}]  }
   0x1   :  { %2607 = sst [smem:[#allocation26_spill]] %s2587_s0 }
   0x2   :  { %2608 = sst [smem:[#allocation27_spill]] %s2589_s2 }
   0x3   :  { %2609 = sst [smem:[#allocation28_spill]] %s2590_s3 }
   0x4   :  { %2610 = sst [smem:[#allocation29_spill]] %s2591_s4 }
   0x5   :  { %2611 = sst [smem:[#allocation30_spill]] %s2592_s5 }
   0x6   :  { %10 = vsyncpa [#allocation5], 0 }
   0x7   :  { %12 = vsyncpa [#allocation5 + $0x1], 0 }
   0x8   :  { %13 = vsyncpa [#allocation8], 0 }
   0x9   :  { %15 = vsyncpa [#allocation8 + $0x1], 0 }
   0xa   :  { %16 = vsyncpa [#allocation11], 0 }
   0xb   :  { %17 = vsyncpa [#allocation6], 0 }
   0xc   :  { %19 = vsyncpa [#allocation6 + $0x1], 0  ;;  %s2083_s18 = smov 0   ;;  %s2085_s19 = smov 0  }
   0xd   :  { %s2087_s20 = smov 0   ;;  %s2089_s21 = smov 0  }
   0xe   :  { %s2091_s22 = smov 0   ;;  %s2093_s23 = smov 0  }
   0xf   :  { %s2095_s24 = smov 0   ;;  %s2097_s25 = smov 0  }
  0x10 LB: > { %2612 = sst [smem:[#allocation19_spill]] %s2000_s18  ;;  %s2124_s26 = sadd.s32 4294967295, %s2028_s25   ;;  %s2028_s25 = sphi %s2097_s25, %s25_s25   ;;  %s2024_s24 = sphi %s2095_s24, %s2661_s24   ;;  %s2020_s23 = sphi %s2093_s23, %s2660_s23   ;;  %s2016_s22 = sphi %s2091_s22, %s2659_s22   ;;  %s2012_s21 = sphi %s2089_s21, %s2658_s21   ;;  %s2008_s20 = sphi %s2087_s20, %s2657_s20   ;;  %s2004_s19 = sphi %s2085_s19, %s2656_s19   ;;  %s2000_s18 = sphi %s2083_s18, %s2655_s18  }
  0x11   : > { %2613 = sst [smem:[#allocation20_spill]] %s2012_s21  ;;  %s1288_s27 = sadd.s32 4294967294, %s2028_s25  }
  0x12   : > { %2614 = sst [smem:[#allocation21_spill]] %s2016_s22  ;;  %p53_p0 = scmp.ne.s32.totalorder %s2008_s20, %s2004_s19 }
  0x13   : > { %p54_p1 = scmp.eq.s32.totalorder %s2028_s25, 0  ;;  %p59_p2 = scmp.ne.s32.totalorder %s2004_s19, %s2000_s18 }
  0x14   : > { %p2593_p3 = scmp.eq.s32.totalorder %s2124_s26, 0  ;;  %p176_p4 = scmp.eq.s32.totalorder %s2124_s26, 3 }
  0x15   : > { %p2135_p5 = por %p54_p1, %p53_p0  ;;  %p182_p6 = scmp.eq.s32.totalorder %s1288_s27, 3 }
  0x16   : > { %p2141_p7 = por %p2593_p3, %p59_p2  ;;  %p2145_p8 = por %p176_p4, %p53_p0 }
  0x17   : > { %p2149_p9 = por %p182_p6, %p59_p2  ;;  %p1289_p10 = scmp.ge.s32.totalorder %s2028_s25, 1 }
  0x18   : > { %s2616_s30 = scalar_select %p2141_p7, 1, 0 }
  0x19   : > { %s2617_s6 = scalar_select %p2145_p8, 1, 0 }
  0x1a   : > { %s2619_s7 = scalar_select %p2149_p9, 1, 0 }
  0x1b   : > { %2618 = sst [smem:[#allocation22_spill]] %s2617_s6  ;;  %p189_p11 = scmp.lt.s32.totalorder %s2028_s25, 5 }
  0x1c   : > { %2620 = sst [smem:[#allocation23_spill]] %s2619_s7  ;;  %s2030_s9 = smov [#allocation9]  }
  0x1d   : > { %p2155_p12 = pnand %p1289_p10, %p189_p11  ;;  %s201_s10 = sshll.u32 %s2030_s9, 4  ;;  %s2159_s10 = int_to_ptr.vmem [resolvable:$true] %s201_s10 }
  0x1e   : > { %p1563_p0 = scmp.lt.s32.totalorder %s2028_s25, 4  ;;  %s2031_s12 = smov [#allocation10]  }
  0x1f   : > { %s2621_s8 = scalar_select %p2155_p12, 1, 0 }
  0x20   : > { %p1539_p13 = pneg %p2155_p12  ;;  %s214_s13 = sshll.u32 %s2031_s12, 4  ;;  %s2176_s13 = int_to_ptr.vmem [resolvable:$true] %s214_s13 }
  0x21   : > { %p2172_p2 = pnand %p1563_p0, %p2135_p5  ;;  %s2624_s2 = sld [smem:[#allocation27_spill]] }
  0x22   : > { %p2166_p1 = pnand %p1539_p13, %p2593_p3 }
  0x23   : > { %s2623_s14 = scalar_select %p2172_p2, 1, 0 }
  0x24   : > { %p2186_p6 = pneg %p2166_p1 }
  0x27   : > { %s1774_s17 = scalar_lea.hbm %s2624_s2, 256 }
  0x28   : > { %p1775_p4 = scmp.ne.s32.totalorder %s2624_s2, %s1774_s17  ;;  %p1781_p11 = scmp.lt.u32.totalorder %s1774_s17, %s2624_s2 }
  0x2a   : > { %p1777_p5 = pnand %p2186_p6, %p1775_p4 }
  0x2c   : > { %p1778_p10 = pneg %p1777_p5 }
  0x2e   : > { %p1783_p13 = pnand %p1781_p11, %p1778_p10 }
  0x30   : > { %1786 = shalt.err (!%p1783_p13)
}
  0x31   : > { %s1787_s15 = scalar_lea.vmem %s2159_s10, 256  ;;  %p1795_p8 = scmp.lt.s32.totalorder %s2159_s10, %s2159_s10 }
  0x32   : > { %p1788_p0 = scmp.ne.s32.totalorder %s2159_s10, %s1787_s15  ;;  %p1796_p7 = scmp.lt.s32.totalorder %s1787_s15, %s1787_s15 }
  0x34   : > { %p1790_p3 = pnand %p1788_p0, %p2186_p6  ;;  %p1797_p4 = por %p1796_p7, %p1795_p8 }
  0x36   : > { %p1791_p9 = pneg %p1790_p3 }
  0x38   : > { %p1798_p5 = pnand %p1797_p4, %p1791_p9 }
  0x3a   : > { %1801 = shalt.err (!%p1798_p5)
}
  0x3b   : > { %s2032_s16 = smov 128   ;;  %s2033_s17 = smov 8  }
  0x3c   : > { %1542 = dma.hbm_to_vmem [thread:$0]  (!%p2166_p1), %s2624_s2, 256, %s2159_s10, [#allocation8], %s2032_s16, %s2032_s16, %s2033_s17  }
  0x3d   : > { %s2034_s29 = smov [#allocation12]   ;;  %s2626_s3 = sld [smem:[#allocation28_spill]] }
  0x3e   : > { %s227_s12 = sshll.u32 %s2034_s29, 4  ;;  %s228_s12 = int_to_ptr.vmem [resolvable:$true] %s227_s12 }
  0x43   : > { %s1802_s18 = scalar_lea.hbm %s2626_s3, 256 }
  0x44   : > { %p1803_p3 = scmp.ne.s32.totalorder %s2626_s3, %s1802_s18  ;;  %p1809_p9 = scmp.lt.u32.totalorder %s1802_s18, %s2626_s3 }
  0x46   : > { %p1805_p7 = pnand %p1803_p3, %p2186_p6 }
  0x48   : > { %p1806_p8 = pneg %p1805_p7 }
  0x4a   : > { %p1811_p10 = pnand %p1809_p9, %p1806_p8 }
  0x4c   : > { %1814 = shalt.err (!%p1811_p10)
}
  0x4d   : > { %s1815_s10 = scalar_lea.vmem %s2176_s13, 256  ;;  %p1823_p4 = scmp.lt.s32.totalorder %s2176_s13, %s2176_s13 }
  0x4e   : > { %p1816_p11 = scmp.ne.s32.totalorder %s2176_s13, %s1815_s10  ;;  %p1824_p5 = scmp.lt.s32.totalorder %s1815_s10, %s1815_s10 }
  0x50   : > { %p1818_p13 = pnand %p1816_p11, %p2186_p6  ;;  %p1825_p3 = por %p1824_p5, %p1823_p4 }
  0x52   : > { %p1819_p0 = pneg %p1818_p13 }
  0x54   : > { %p1826_p7 = pnand %p1825_p3, %p1819_p0 }
  0x56   : > { %1829 = shalt.err (!%p1826_p7)
}
  0x57   : > { %1545 = dma.hbm_to_vmem [thread:$0]  (!%p2166_p1), %s2626_s3, 256, %s2176_s13, [#allocation11], %s2032_s16, %s2032_s16, %s2033_s17  }
  0x58   : > { %s2627_s4 = sld [smem:[#allocation29_spill]] }
  0x5e   : > { %s1830_s6 = scalar_lea.hbm %s2627_s4, 2048 }
  0x5f   : > { %p1831_p8 = scmp.ne.s32.totalorder %s2627_s4, %s1830_s6  ;;  %p1837_p11 = scmp.lt.u32.totalorder %s1830_s6, %s2627_s4 }
  0x61   : > { %p1833_p9 = pnand %p1831_p8, %p2186_p6 }
  0x63   : > { %p1834_p10 = pneg %p1833_p9 }
  0x65   : > { %p1839_p13 = pnand %p1837_p11, %p1834_p10 }
  0x67   : > { %1842 = shalt.err (!%p1839_p13)
}
  0x68   : > { %s1843_s15 = scalar_lea.vmem %s228_s12, 2048  ;;  %p1851_p3 = scmp.lt.s32.totalorder %s228_s12, %s228_s12 }
  0x69   : > { %p1844_p0 = scmp.ne.s32.totalorder %s228_s12, %s1843_s15  ;;  %p1852_p7 = scmp.lt.s32.totalorder %s1843_s15, %s1843_s15 }
  0x6b   : > { %p1846_p4 = pnand %p1844_p0, %p2186_p6  ;;  %p1853_p12 = por %p1852_p7, %p1851_p3 }
  0x6d   : > { %p1847_p5 = pneg %p1846_p4 }
  0x6f   : > { %p1854_p2 = pnand %p1853_p12, %p1847_p5 }
  0x71   : > { %1857 = shalt.err (!%p1854_p2)
}
  0x72   : > { %s2604_s13 = smov 256   ;;  %s2036_s10 = smov 16  }
  0x73   : > { %1548 = dma.hbm_to_vmem [thread:$0]  (!%p2166_p1), %s2627_s4, 2048, %s228_s12, [#allocation11], %s2604_s13, %s2604_s13, %s2036_s10  }
  0x74   : > { %s34_s18 = sadd.s32 1, %s2020_s23  ;;  %s37_s21 = sadd.s32 1, %s2024_s24 }
  0x75   : > { %p35_p12 = scmp.ge.s32.totalorder %s34_s18, 2  ;;  %s2259_s22 = sand.u32 1, %s2008_s20  }
  0x76   : > { %s1295_s6 = sshll.u32 %s2024_s24, 4  ;;  %s1294_s7 = sshll.u32 %s2259_s22, 6 }
  0x77   : > { %s2663_s18 = smov (%p35_p12, %s34_s18), 0  ;;  %s2665_s21 = smov (!%p35_p12, %s37_s21), %s2024_s24 }
  0x78   : > { %2628 = sst [smem:[#allocation24_spill]] %s2663_s18  ;;  %s42_s11 = ssub.s32 %s2020_s23, %s2663_s18 }
  0x79   : > { %p39_p2 = scmp.ge.s32.totalorder %s2665_s21, 2  ;;  %s250_s12 = sadd.s32 %s2020_s23, %s1295_s6 }
  0x7a   : > { %s1296_s27 = sshll.u32 %s250_s12, 7  ;;  %s245_s9 = scalar_lea.vmem [#allocation4], %s1294_s7 }
  0x7b   : > { %s2667_s21 = smov (%p39_p2, %s2665_s21), 0  ;;  %s253_s29 = sshll.u32 %s245_s9, 4  ;;  %s2280_s29 = int_to_ptr.vmem [resolvable:$true] %s253_s29 }
  0x7c   : > { %2629 = sst [smem:[#allocation25_spill]] %s2667_s21  ;;  %s41_s15 = ssub.s32 %s2024_s24, %s2667_s21 }
  0x7d   : > { %s2630_s0 = sld [smem:[#allocation26_spill]]  ;;  %s2278_s13 = sor.u32 %s42_s11, %s41_s15 }
  0x7e   : > { %p44_p1 = scmp.eq.s32.totalorder %s2278_s13, 0  ;;  %s242_s12 = scalar_lea.sflag [#allocation5], %s2259_s22 }
  0x7f   : > { %p2631_p8 = scmp.ne.s32.totalorder %s2623_s14, 0 }
  0x81   : > { %p1860_p9 = pneg %p2631_p8 }
  0x83   : > { %s2276_s5 = scalar_lea.hbm %s2630_s0, %s1296_s27  ;;  %s1863_s10 = scalar_lea.hbm %s2630_s0, 4096 }
  0x84   : > { %s1858_s7 = scalar_lea.hbm %s2276_s5, 1024  ;;  %p1864_p13 = scmp.lt.u32.totalorder %s2276_s5, %s2630_s0 }
  0x85   : > { %p1859_p6 = scmp.ne.s32.totalorder %s2276_s5, %s1858_s7  ;;  %p1865_p0 = scmp.lt.u32.totalorder %s1863_s10, %s1858_s7 }
  0x86   : > { %p1867_p5 = scmp.lt.u32.totalorder %s1858_s7, %s2276_s5 }
  0x87   : > { %p1861_p10 = pnand %p1860_p9, %p1859_p6  ;;  %p1866_p4 = por %p1865_p0, %p1864_p13 }
  0x89   : > { %p1862_p11 = pneg %p1861_p10  ;;  %p1868_p3 = por %p1867_p5, %p1866_p4 }
  0x8b   : > { %p1869_p7 = pnand %p1868_p3, %p1862_p11 }
  0x8d   : > { %1872 = shalt.err (!%p1869_p7)
}
  0x8e   : > { %s1873_s28 = scalar_lea.vmem %s2280_s29, 1024  ;;  %s2037_s27 = smov [#allocation4]  }
  0x8f   : > { %p1874_p12 = scmp.ne.s32.totalorder %s2280_s29, %s1873_s28  ;;  %s1878_s9 = sshll.u32 %s2037_s27, 4  ;;  %s1879_s9 = int_to_ptr.vmem [resolvable:$false] %s1878_s9 }
  0x90   : > { %s1880_s11 = scalar_lea.vmem %s1879_s9, 2048  ;;  %p1881_p10 = scmp.lt.s32.totalorder %s2280_s29, %s1879_s9 }
  0x91   : > { %p1876_p2 = pnand %p1874_p12, %p1860_p9  ;;  %p1882_p13 = scmp.lt.s32.totalorder %s1880_s11, %s1873_s28 }
  0x93   : > { %p1877_p6 = pneg %p1876_p2  ;;  %p1883_p0 = por %p1882_p13, %p1881_p10 }
  0x95   : > { %p1884_p4 = pnand %p1883_p0, %p1877_p6 }
  0x97   : > { %1887 = shalt.err (!%p1884_p4)
}
  0x98   : > { %s2632_s7 = smov 256   ;;  %s2633_s10 = sadd.s32 1, %s2008_s20 }
  0x99   : > { %1552 = dma.hbm_to_vmem [thread:$0]  (!%p2631_p8), %s2276_s5, 1024, %s2280_s29, %s242_s12, %s2632_s7, %s2032_s16, %s2033_s17  }
  0x9a   : > { %s2320_s15 = scalar_select %p44_p1, %s2008_s20, %s2633_s10  }
  0x9b   : > { %s1297_s28 = sshll.u32 %s2259_s22, 7  ;;  %s1298_s27 = sshll.u32 %s2020_s23, 4 }
  0x9c   : > { %s1299_s9 = sshll.u32 %s2024_s24, 5  ;;  %s267_s11 = scalar_lea.vmem [#allocation7], %s1297_s28 }
  0x9d   : > { %s276_s6 = sshll.u32 %s267_s11, 4  ;;  %s273_s0 = sadd.s32 %s1299_s9, %s1298_s27  ;;  %s2325_s6 = int_to_ptr.vmem [resolvable:$true] %s276_s6 }
  0x9e   : > { %s1300_s2 = sshll.u32 %s273_s0, 7  ;;  %s2634_s18 = sand.u32 1, %s2028_s25  }
  0x9f   : > { %s2330_s21 = scalar_lea.hbm %s2588_s1, %s1300_s2  ;;  %s2334_s13 = scalar_lea.sflag [#allocation8], %s2634_s18 }
  0xa0   : > { %s1888_s22 = scalar_lea.hbm %s2330_s21, 2048  ;;  %s1893_s5 = scalar_lea.hbm %s2588_s1, 8192 }
  0xa1   : > { %p1889_p1 = scmp.ne.s32.totalorder %s2330_s21, %s1888_s22  ;;  %p1894_p3 = scmp.lt.u32.totalorder %s2330_s21, %s2588_s1 }
  0xa2   : > { %p1895_p7 = scmp.lt.u32.totalorder %s1893_s5, %s1888_s22  ;;  %p1897_p2 = scmp.lt.u32.totalorder %s1888_s22, %s2330_s21 }
  0xa3   : > { %p1891_p11 = pnand %p1889_p1, %p1860_p9 }
  0xa4   : > { %p1896_p12 = por %p1895_p7, %p1894_p3 }
  0xa5   : > { %p1892_p5 = pneg %p1891_p11 }
  0xa6   : > { %p1898_p6 = por %p1897_p2, %p1896_p12 }
  0xa8   : > { %p1899_p10 = pnand %p1898_p6, %p1892_p5 }
  0xaa   : > { %1902 = shalt.err (!%p1899_p10)
}
  0xab   : > { %s1903_s4 = scalar_lea.vmem %s2325_s6, 2048  ;;  %s2038_s18 = smov [#allocation7]  }
  0xac   : > { %p1904_p13 = scmp.ne.s32.totalorder %s2325_s6, %s1903_s4  ;;  %s1908_s12 = sshll.u32 %s2038_s18, 4  ;;  %s1909_s12 = int_to_ptr.vmem [resolvable:$false] %s1908_s12 }
  0xad   : > { %s1910_s7 = scalar_lea.vmem %s1909_s12, 4096  ;;  %p1911_p1 = scmp.lt.s32.totalorder %s2325_s6, %s1909_s12 }
  0xae   : > { %p1906_p0 = pnand %p1904_p13, %p1860_p9  ;;  %p1912_p11 = scmp.lt.s32.totalorder %s1910_s7, %s1903_s4 }
  0xb0   : > { %p1907_p4 = pneg %p1906_p0  ;;  %p1913_p3 = por %p1912_p11, %p1911_p1 }
  0xb2   : > { %p1914_p7 = pnand %p1913_p3, %p1907_p4 }
  0xb4   : > { %1917 = shalt.err (!%p1914_p7)
}
  0xb5   : > { %1555 = dma.hbm_to_vmem [thread:$0]  (!%p2631_p8), %s2330_s21, 2048, %s2325_s6, %s2334_s13, %s2032_s16, %s2032_s16, %s2033_s17  }
  0xb6   : > { %p2635_p9 = scmp.ne.s32.totalorder %s2621_s8, 0 }
  0xb7   : > { %s2366_s10 = sand.u32 (!%p2635_p9), 1, %s2004_s19   ;;  %p2636_p5 = scmp.ne.s32.totalorder (!%p2635_p9), %s2616_s30, 0 }
  0xb8   : > { %288 = sbr.rel (%p2635_p9) target bundleno = 1031 (0x407), region = 40  ;;  %s1302_s28 = sshll.u32 (!%p2635_p9), %s2366_s10, 6 }
  0xb9   : > { %s291_s27 = scalar_lea.sflag (!%p2635_p9), [#allocation5], %s2366_s10  ;;  %s2372_s14 = scalar_lea.vmem (!%p2635_p9), [#allocation4], %s1302_s28 }
  0xbf   : > { %1979 = dma.done.wait (%p2636_p5), %s291_s27, 1024  }
  0xc0   : > { %1981 = vsyncadd (%p2636_p5), %s291_s27, 4294966272  ;;  %s299_s8 = sand.u32 1, %s2124_s26   ;;  %s1303_s16 = sshll.u32 %s2366_s10, 7 }
  0xc1   : > { %s300_s17 = scalar_lea.sflag [#allocation8], %s299_s8  ;;  %s2380_s21 = scalar_lea.vmem [#allocation7], %s1303_s16 }
  0xc2   : > { %1983 = dma.done.wait (%p2636_p5), %s300_s17, 2048  }
  0xc3   : > { %1985 = vsyncadd (%p2636_p5), %s300_s17, 4294965248  ;;  %p2637_p8 = scmp.eq.s32.totalorder %s2124_s26, 0 }
  0xc5   : > { %1987 = dma.done.wait (%p2637_p8), [#allocation8], 256   ;;  %p2638_p12 = pmov %p2637_p8 }
  0xc6   : > { %p2639_p2 = pmov %p2637_p8 }
  0xc7   : > { %1989 = vsyncadd (%p2638_p12), [#allocation8], 4294967040 }
  0xc8   : > { %1991 = dma.done.wait (%p2639_p2), [#allocation11], 2304   ;;  %p2640_p6 = pmov %p2639_p2 }
  0xc9   : > { %v2039_v0 = vmov 0   ;;  %v2395_v1 = vld [vmem:[%s2372_s14] sm:$0xff]  ;;  %v2398_v2 = vld [vmem:[%s2372_s14 + $0x8] sm:$0xff]  ;;  %v2401_v3 = vld [vmem:[%s2372_s14 + $0x10] sm:$0xff]  ;;  %vm369_vm0 = vcmask 523264   ;;  %s2641_s26 = sld [smem:[#allocation20_spill]] }
  0xca   : > { %1993 = vsyncadd (%p2640_p6), [#allocation11], 4294964992  ;;  %1653 = vset.pattern.permute.xlu1 %v2039_v0  ;;  %1652 = vset.pattern.permute.xlu0 %v2039_v0  ;;  %v1440_v4 = vpack.c.bf16 %v2398_v2, %v2395_v1  ;;  %v2406_v5 = vld [vmem:[%s2372_s14 + $0x18] sm:$0xff]  ;;  %v2411_v7 = vld [vmem:[%s2372_s14 + $0x20] sm:$0xff]  ;;  %s2040_s6 = smov 112   ;;  %vm705_vm3 = vcmask 130048  }
  0xcb   : > { %v1444_v6 = vpack.c.bf16 %v2406_v5, %v2401_v3  ;;  %v2414_v8 = vld [vmem:[%s2372_s14 + $0x28] sm:$0xff]  ;;  %v355_v9 = vld [vmem:[#allocation9] sm:$0xff]  ;;  %v2420_v11 = vld [vmem:[%s2372_s14 + $0x30] sm:$0xff]  ;;  %vm702_vm4 = vcmask 1048448   ;;  %s2042_s11 = smov 17   ;;  %s2043_s13 = smov 16  }
  0xcc   : > { %1441 = vmatprep.subr.bf16.mxu0 %v1440_v4  ;;  %1399 = vmatprep.mubr.msk.f32.mxu0 %vm369_vm0, %v355_v9  ;;  %v1448_v10 = vpack.c.bf16 %v2414_v8, %v2411_v7  ;;  %v2423_v12 = vld [vmem:[%s2372_s14 + $0x38] sm:$0xff]  ;;  %v357_v13 = vld [vmem:[#allocation10] sm:$0xff]  ;;  %v467_v15 = vld [vmem:[%s2380_s21] sm:$0xff]  ;;  %s2044_s22 = smov 15   ;;  %s2045_s29 = smov 1   ;;  %vm742_vm5 = vcmask 138240  }
  0xcd   : > { %1443 = vmatpush3.bf16.msra.mxu0 %v1440_v4  ;;  %v1452_v14 = vpack.c.bf16 %v2423_v12, %v2420_v11  ;;  %361 = vperm.xlu1 %1653, %v357_v13   ;;  %v468_v16 = vld [vmem:[%s2380_s21 + $0x8] sm:$0xff]  ;;  %v358_v17 = vld [vmem:[#allocation10 + $0x8] sm:$0xff]  ;;  %v469_v19 = vld [vmem:[%s2380_s21 + $0x10] sm:$0xff]  ;;  %s2046_s0 = smov 127   ;;  %s2047_s5 = smov 113   ;;  %vm791_vm8 = vcmask 121856  }
  0xce   : > { %1445 = vmatprep.subr.bf16.mxu0 %v1444_v6  ;;  %481 = vperm.xlu0 %1652, %v357_v13   ;;  %v1456_v18 = vpack.c.bf16 %v468_v16, %v467_v15  ;;  %v470_v20 = vld [vmem:[%s2380_s21 + $0x18] sm:$0xff]  ;;  %v356_v21 = vld [vmem:[#allocation9 + $0x8] sm:$0xff]  ;;  %v471_v23 = vld [vmem:[%s2380_s21 + $0x20] sm:$0xff]  ;;  %s2048_s3 = smov 111   ;;  %vm816_vm10 = vcmask 7168   ;;  %vm845_vm12 = vcmask 1039360  }
  0xcf   : > { %v1460_v22 = vpack.c.bf16 %v470_v20, %v469_v19  ;;  %v472_v24 = vld [vmem:[%s2380_s21 + $0x28] sm:$0xff]  ;;  %v473_v26 = vld [vmem:[%s2380_s21 + $0x30] sm:$0xff]  ;;  %v474_v27 = vld [vmem:[%s2380_s21 + $0x38] sm:$0xff]  ;;  %p682_p10 = scmp.gt.s32.totalorder %s2641_s26, 0  ;;  %p688_p13 = scmp.lt.s32.totalorder %s2641_s26, 1  ;;  %vm870_vm13 = vcmask 924672  }
  0xd0   : > { %v1464_v25 = vpack.c.bf16 %v472_v24, %v471_v23  ;;  %v1468_v28 = vpack.c.bf16 %v474_v27, %v473_v26  ;;  %v1316_v29 = vld [vmem:[%s2380_s21 + $0x40] sm:$0xff]  ;;  %v1317_v30 = vld [vmem:[%s2380_s21 + $0x48] sm:$0xff]  ;;  %v1318_v32 = vld [vmem:[%s2380_s21 + $0x50] sm:$0xff]  ;;  %vm895_vm14 = vcmask 916480   ;;  %vm918_vm15 = vcmask 908288   ;;  %s2508_s2 = scalar_lea.vmem [#allocation13], %s1302_s28 }
  0xd1   : > { %1447 = vmatpush3.bf16.msra.mxu0 %v1444_v6  ;;  %366 = vperm.xlu1 %1653, %v358_v17   ;;  %v1472_v31 = vpack.c.bf16 %v1317_v30, %v1316_v29  ;;  %v1319_v33 = vld [vmem:[%s2380_s21 + $0x58] sm:$0xff]  ;;  %v1320_v35 = vld [vmem:[%s2380_s21 + $0x60] sm:$0xff]  ;;  %v1321_v36 = vld [vmem:[%s2380_s21 + $0x68] sm:$0xff]  ;;  %s683_s30 = scalar_select %p682_p10, 1, 0 }
  0xd2   : > { %1449 = vmatprep.subr.bf16.mxu0 %v1448_v10  ;;  %486 = vperm.xlu0 %1652, %v358_v17   ;;  %v1476_v34 = vpack.c.bf16 %v1319_v33, %v1318_v32  ;;  %v1480_v37 = vpack.c.bf16 %v1321_v36, %v1320_v35  ;;  %v1322_v38 = vld [vmem:[%s2380_s21 + $0x70] sm:$0xff]  ;;  %v1323_v39 = vld [vmem:[%s2380_s21 + $0x78] sm:$0xff]  ;;  %s689_s9 = scalar_select %p688_p13, 1, 0 }
  0xd3   : > { %v1484_v40 = vpack.c.bf16 %v1323_v39, %v1322_v38  ;;  %v684_v19 = vstv %s683_s30  ;;  %v2041_v39 = vmov 0.0|0.0   ;;  %s2646_s4 = sld [smem:[#allocation21_spill]]  ;;  %s2647_s7 = sld [smem:[#allocation22_spill]] }
  0xd4   : > { %vm685_vm1 = vcmp.eq.s32.totalorder %v684_v19, 1  ;;  %v690_v30 = vstv %s689_s9  ;;  %1488 = vmatprep.subr.bf16.mxu1 %v2041_v39  ;;  %s1145_s28 = sshll.u32 %s2508_s2, 4  ;;  %s2648_s16 = sld [smem:[#allocation30_spill]]  ;;  %s2525_s28 = int_to_ptr.vmem [resolvable:$true] %s1145_s28 }
  0xd5   : > { %1451 = vmatpush3.bf16.msra.mxu0 %v1448_v10  ;;  %vm691_vm2 = vcmp.eq.s32.totalorder %v690_v30, 1  ;;  %s1131_s21 = scalar_lea.sflag [#allocation6], %s2366_s10  ;;  %s2049_s30 = smov [#allocation13]  }
  0xd6   : > { %1453 = vmatprep.subr.bf16.mxu0 %v1452_v14 }
  0xd9   : > { %1455 = vmatpush3.bf16.msra.mxu0 %v1452_v14  ;;  %s1337_s18 = sshll.u32 %s2646_s4, 4  ;;  %p2649_p4 = scmp.ne.s32.totalorder %s2647_s7, 0 }
  0xda   : > { %1457 = vmatprep.subr.bf16.mxu0 %v1456_v18  ;;  %s1142_s12 = sadd.s32 %s2641_s26, %s1337_s18  ;;  %s1918_s26 = scalar_lea.vmem %s2525_s28, 1024 }
  0xdb   : > { %s1338_s27 = sshll.u32 %s1142_s12, 7  ;;  %p1919_p0 = scmp.ne.s32.totalorder %s2525_s28, %s1918_s26 }
  0xdc   : > { %1400 = vmatmul.mubr.msk.f32.vlgmr.msra.gmra.mrb[0].mxu0 %vm369_vm0, %v356_v21  ;;  %s2531_s17 = scalar_lea.hbm %s2648_s16, %s1338_s27 }
  0xdd   : > { %1459 = vmatpush3.bf16.msra.mxu0 %v1456_v18  ;;  %1418 = vmatprep.mubr.msk.f32.mxu0 %vm369_vm0, %v355_v9  ;;  %p1920_p1 = pnand %p1919_p0, %p2649_p4 }
  0xde   : > { %1461 = vmatprep.subr.bf16.mxu0 %v1460_v22 }
  0xdf   : > { %p1921_p11 = pneg %p1920_p1 }
  0xe1   : > { %1463 = vmatpush3.bf16.msra.mxu0 %v1460_v22 }
  0xe2   : > { %1465 = vmatprep.subr.bf16.mxu0 %v1464_v25 }
  0xe5   : > { %1467 = vmatpush3.bf16.msra.mxu0 %v1464_v25 }
  0xe6   : > { %1469 = vmatprep.subr.bf16.mxu0 %v1468_v28 }
  0xe9   : > { %1471 = vmatpush3.bf16.msra.mxu0 %v1468_v28 }
  0xea   : > { %1473 = vmatprep.subr.bf16.mxu0 %v1472_v31 }
  0xec   : > { %1419 = vmatmul.mubr.msk.f32.vlgmr.msra.gmra.mrb[2].mxu0 %vm369_vm0, %v356_v21 }
  0xed   : > { %1475 = vmatpush3.bf16.msra.mxu0 %v1472_v31  ;;  %1437 = vmatprep.mubr.msk.f32.mxu0 %vm369_vm0, %v355_v9 }
  0xee   : > { %1477 = vmatprep.subr.bf16.mxu0 %v1476_v34 }
  0xf1   : > { %1479 = vmatpush3.bf16.msra.mxu0 %v1476_v34 }
  0xf2   : > { %1481 = vmatprep.subr.bf16.mxu0 %v1480_v37 }
  0xf5   : > { %1483 = vmatpush3.bf16.msra.mxu0 %v1480_v37 }
  0xf6   : > { %1485 = vmatprep.subr.bf16.mxu0 %v1484_v40 }
  0xf9   : > { %1487 = vmatpush3.bf16.msra.mxu0 %v1484_v40 }
  0xfc   : > { %1438 = vmatmul.mubr.msk.f32.vlgmr.msra.gmra.mrb[4].mxu0 %vm369_vm0, %v356_v21 }
 0x14c   : > { %v362_v41 = vpop.permute.xlu1 %361 }
 0x14d   : > { %v482_v49 = vpop.permute.xlu0 %481 }
 0x150   : > { %v367_v42 = vpop.permute.xlu1 %366 }
 0x151   : > { %v487_v53 = vpop.permute.xlu0 %486 }
 0x1af   : > { %v1401_v43 = vpop.f32.mrb[0].mxu0 }
 0x1b0   : > { %v448_v44 = vadd.f32 %v1401_v43, %v367_v42  ;;  %v442_v45 = vpop.f32.mrb[1].mxu0 }
 0x1b1   : > { %v443_v46 = vadd.f32 %v442_v45, %v362_v41 }
 0x1b2   : > { %v1311_v47 = vmul.f32 -1.442695, %v448_v44 }
 0x1b3   : > { %v1310_v48 = vmul.f32 -1.442695, %v443_v46 }
 0x1b4   : > { %1734 = vpow2.f32 %v1311_v47 }
 0x1b5   : > { %1736 = vpow2.f32 %v1310_v48  ;;  %v928_v48 = vld [vmem:[#allocation12 + $0x8] sm:$0xff] }
 0x1b6   : > { %1328 = vmatprep.mubr.msk.f32.mxu1 %vm705_vm3, %v928_v48 }
 0x1be   : > { %v1735_v50 = vpop.eup %1734 }
 0x1bf   : > { %v1737_v51 = vpop.eup %1736  ;;  %v458_v52 = vadd.f32 1.0, %v1735_v50  ;;  %v1420_v54 = vpop.f32.mrb[2].mxu0 }
 0x1c0   : > { %v457_v55 = vadd.f32 1.0, %v1737_v51  ;;  %v567_v56 = vadd.f32 %v1420_v54, %v487_v53  ;;  %v561_v57 = vpop.f32.mrb[3].mxu0 }
 0x1c1   : > { %1738 = vrcp.f32 %v458_v52  ;;  %v562_v58 = vadd.f32 %v561_v57, %v482_v49 }
 0x1c2   : > { %1740 = vrcp.f32 %v457_v55  ;;  %v1315_v59 = vmul.f32 -1.442695, %v567_v56 }
 0x1c3   : > { %v1314_v60 = vmul.f32 -1.442695, %v562_v58 }
 0x1c4   : > { %1742 = vpow2.f32 %v1315_v59 }
 0x1c5   : > { %1744 = vpow2.f32 %v1314_v60 }
 0x1cb   : > { %v1739_v61 = vpop.eup %1738 }
 0x1cc   : > { %v1741_v62 = vpop.eup %1740  ;;  %v2448_v63 = vmul.f32 %v1739_v61, %v448_v44  ;;  %v932_v61 = vld [vmem:[#allocation12 + $0x28] sm:$0xff] }
 0x1cd   : > { %v2450_v0 = vmul.f32 %v1741_v62, %v443_v46 }
 0x1ce   : > { %v1743_v4 = vpop.eup %1742 }
 0x1cf   : > { %v1745_v6 = vpop.eup %1744  ;;  %v577_v9 = vadd.f32 1.0, %v1743_v4  ;;  %v1439_v10 = vpop.f32.mrb[4].mxu0 }
 0x1d0   : > { %v576_v13 = vadd.f32 1.0, %v1745_v6  ;;  %v665_v14 = vadd.f32 %v1439_v10, %v487_v53  ;;  %v659_v15 = vpop.f32.mrb[5].mxu0 }
 0x1d1   : > { %1746 = vrcp.f32 %v577_v9  ;;  %v660_v16 = vadd.f32 %v659_v15, %v482_v49  ;;  %v708_v49 = vlaneseq }
 0x1d2   : > { %1748 = vrcp.f32 %v576_v13  ;;  %v1327_v17 = vmul.f32 -1.442695, %v665_v14 }
 0x1d3   : > { %v1326_v18 = vmul.f32 -1.442695, %v660_v16  ;;  %v709_v50 = vand.u32 127, %v708_v49 }
 0x1d4   : > { %1750 = vpow2.f32 %v1327_v17 }
 0x1d5   : > { %1752 = vpow2.f32 %v1326_v18  ;;  %v714_v51 = vand.u32 15, %v709_v50 }
 0x1d7   : > { %vm722_vm6 = vcmp.ge.s32.totalorder %v714_v51, 1  ;;  %vm723_vm9 = vcmp.le.s32.totalorder %v714_v51, 14 }
 0x1d8   : > { %vm2466_vm7 = vmpackc.low %vm722_vm6, %vm722_vm6 }
 0x1d9   : > { %vm2476_vm11 = vmpackc.low %vm723_vm9, %vm723_vm9 }
 0x1db   : > { %v1747_v20 = vpop.eup %1746 }
 0x1dc   : > { %v1749_v21 = vpop.eup %1748  ;;  %v583_v22 = vmul.f32 %v1747_v20, %v567_v56 }
 0x1dd   : > { %v582_v23 = vmul.f32 %v1749_v21, %v562_v58 }
 0x1de   : > { %v1751_v24 = vpop.eup %1750  ;;  %v687_v25 = vsel %vm685_vm1, %v583_v22, 0.0 }
 0x1df   : > { %v1753_v26 = vpop.eup %1752  ;;  %v675_v27 = vadd.f32 1.0, %v1751_v24  ;;  %698 = vrot.lane.b32.xlu1 %v687_v25, %s2040_s6  ;;  %v686_v28 = vsel %vm685_vm1, %v582_v23, 0.0 }
 0x1e0   : > { %v674_v29 = vadd.f32 1.0, %v1753_v26  ;;  %696 = vrot.lane.b32.xlu0 %v686_v28, %s2040_s6  ;;  %v938_v26 = vld [vmem:[#allocation12 + $0x58] sm:$0xff] }
 0x1e1   : > { %1754 = vrcp.f32 %v675_v27 }
 0x1e2   : > { %1756 = vrcp.f32 %v674_v29 }
 0x1eb   : > { %v1755_v31 = vpop.eup %1754 }
 0x1ec   : > { %v1757_v32 = vpop.eup %1756  ;;  %v681_v33 = vmul.f32 %v1755_v31, %v665_v14 }
 0x1ed   : > { %v680_v34 = vmul.f32 %v1757_v32, %v660_v16 }
 0x1ee   : > { %v693_v35 = vsel %vm691_vm2, %v681_v33, 0.0 }
 0x1ef   : > { %707 = vst.msk [vmem:[#allocation2 + $0x28] sm:$0xff] %vm705_vm3, %v693_v35  ;;  %v692_v36 = vsel %vm691_vm2, %v680_v34, 0.0 }
 0x1f0   : > { %706 = vst.msk [vmem:[#allocation2 + $0x10] sm:$0xff] %vm705_vm3, %v692_v36 }
 0x1f6   : > { %v832_v44 = vld [vmem:[#allocation2 + $0x28] sm:$0xff] }
 0x1f7   : > { %v830_v45 = vld [vmem:[#allocation2 + $0x10] sm:$0xff]  ;;  %v1699_v46 = vpack.i.bf16 %v832_v44, %v2448_v63 }
 0x1f8   : > { %v1694_v47 = vpack.i.bf16 %v830_v45, %v2450_v0 }
 0x251   : > { %v699_v37 = vpop.permute.xlu1 %698 }
 0x252   : > { %704 = vst.msk [vmem:[#allocation2 + $0x18] sm:$0xff] %vm702_vm4, %v699_v37  ;;  %v697_v38 = vpop.permute.xlu0 %696 }
 0x253   : > { %703 = vst.msk [vmem:[#allocation2] sm:$0xff] %vm702_vm4, %v697_v38 }
 0x259   : > { %v726_v40 = vld [vmem:[#allocation2 + $0x18] sm:$0xff] }
 0x25a   : > { %v1654_v41 = vpack.i.bf16 %v2448_v63, %v726_v40  ;;  %v724_v42 = vld [vmem:[#allocation2] sm:$0xff] }
 0x25b   : > { %v1669_v43 = vpack.i.bf16 %v2450_v0, %v724_v42 }
 0x25c   : > { %1655 = vrot.lane.b32.xlu1 %v1654_v41, %s2042_s11 }
 0x25d   : > { %1670 = vrot.lane.b32.xlu0 %v1669_v43, %s2042_s11 }
 0x260   : > { %1660 = vrot.lane.b32.xlu1 %v1654_v41, %s2043_s13 }
 0x261   : > { %1675 = vrot.lane.b32.xlu0 %v1669_v43, %s2043_s13 }
 0x264   : > { %1665 = vrot.lane.b32.xlu1 %v1654_v41, %s2044_s22 }
 0x265   : > { %1680 = vrot.lane.b32.xlu0 %v1669_v43, %s2044_s22 }
 0x268   : > { %1690 = vrot.lane.b32.xlu1 %v1654_v41, %s2045_s29 }
 0x269   : > { %1685 = vrot.lane.b32.xlu0 %v1669_v43, %s2045_s29 }
 0x26c   : > { %1700 = vrot.lane.b32.xlu1 %v1699_v46, %s2046_s0 }
 0x26d   : > { %1695 = vrot.lane.b32.xlu0 %v1694_v47, %s2046_s0 }
 0x270   : > { %1710 = vrot.lane.b32.xlu1 %v1699_v46, %s2047_s5 }
 0x271   : > { %1705 = vrot.lane.b32.xlu0 %v1694_v47, %s2047_s5 }
 0x274   : > { %1720 = vrot.lane.b32.xlu1 %v1699_v46, %s2040_s6 }
 0x275   : > { %1715 = vrot.lane.b32.xlu0 %v1694_v47, %s2040_s6  ;;  %s1922_s6 = sshll.u32 %s2049_s30, 4  ;;  %s1923_s6 = int_to_ptr.vmem [resolvable:$false] %s1922_s6 }
 0x276   : > { %s1924_s9 = scalar_lea.vmem %s1923_s6, 2048  ;;  %p1925_p3 = scmp.lt.s32.totalorder %s2525_s28, %s1923_s6 }
 0x277   : > { %p1926_p7 = scmp.lt.s32.totalorder %s1924_s9, %s1918_s26 }
 0x278   : > { %1730 = vrot.lane.b32.xlu1 %v1699_v46, %s2048_s3 }
 0x279   : > { %1725 = vrot.lane.b32.xlu0 %v1694_v47, %s2048_s3  ;;  %v1504_v47 = vpack.c.bf16 %v2448_v63, %v2450_v0  ;;  %p1927_p9 = por %p1926_p7, %p1925_p3 }
 0x27b   : > { %p1928_p5 = pnand %p1927_p9, %p1921_p11 }
 0x2ce   : > { %v1656_v52 = vpop.permute.xlu1 %1655 }
 0x2cf   : > { %v1658_v53 = vunpack.i.h.bf16 %v1656_v52  ;;  %v1657_v54 = vunpack.i.l.bf16 %v1656_v52  ;;  %v1671_v55 = vpop.permute.xlu0 %1670 }
 0x2d0   : > { %v1673_v56 = vunpack.i.h.bf16 %v1671_v55  ;;  %v1672_v57 = vunpack.i.l.bf16 %v1671_v55 }
 0x2d1   : > { %v744_v58 = vsel %vm742_vm5, %v1657_v54, %v1658_v53 }
 0x2d2   : > { %v1661_v59 = vpop.permute.xlu1 %1660  ;;  %v743_v60 = vsel %vm742_vm5, %v1672_v57, %v1673_v56 }
 0x2d3   : > { %v1663_v62 = vunpack.i.h.bf16 %v1661_v59  ;;  %v1662_v4 = vunpack.i.l.bf16 %v1661_v59  ;;  %v1676_v6 = vpop.permute.xlu0 %1675  ;;  %v1489_v9 = vpack.c.bf16 %v744_v58, %v743_v60 }
 0x2d4   : > { %v1678_v10 = vunpack.i.h.bf16 %v1676_v6  ;;  %v1677_v13 = vunpack.i.l.bf16 %v1676_v6 }
 0x2d5   : > { %1491 = vmatpush1.bf16.msk.msra.mxu1 %vm2466_vm7, %v1489_v9  ;;  %v768_v14 = vsel %vm705_vm3, %v1662_v4, %v1663_v62 }
 0x2d6   : > { %v1666_v15 = vpop.permute.xlu1 %1665  ;;  %1492 = vmatprep.subr.bf16.mxu1 %v2041_v39  ;;  %v767_v16 = vsel %vm705_vm3, %v1677_v13, %v1678_v10 }
 0x2d7   : > { %v1668_v17 = vunpack.i.h.bf16 %v1666_v15  ;;  %v1667_v18 = vunpack.i.l.bf16 %v1666_v15  ;;  %v1681_v19 = vpop.permute.xlu0 %1680  ;;  %v1493_v20 = vpack.c.bf16 %v768_v14, %v767_v16 }
 0x2d8   : > { %v1683_v21 = vunpack.i.h.bf16 %v1681_v19  ;;  %v1682_v22 = vunpack.i.l.bf16 %v1681_v19  ;;  %v927_v19 = vld [vmem:[#allocation12] sm:$0xff] }
 0x2d9   : > { %v793_v23 = vsel %vm791_vm8, %v1667_v18, %v1668_v17  ;;  %1494 = vmatpush1.bf16.msra.mxu1 %v1493_v20  ;;  %v930_v20 = vld [vmem:[#allocation12 + $0x18] sm:$0xff] }
 0x2da   : > { %v792_v24 = vsel %vm791_vm8, %v1682_v22, %v1683_v21  ;;  %v1691_v25 = vpop.permute.xlu1 %1690  ;;  %1495 = vmatprep.subr.bf16.mxu1 %v2041_v39  ;;  %v929_v21 = vld [vmem:[#allocation12 + $0x10] sm:$0xff]  ;;  %v931_v22 = vld [vmem:[#allocation12 + $0x20] sm:$0xff] }
 0x2db   : > { %v1496_v27 = vpack.c.bf16 %v793_v23, %v792_v24  ;;  %v1693_v28 = vunpack.i.h.bf16 %v1691_v25  ;;  %v1692_v29 = vunpack.i.l.bf16 %v1691_v25  ;;  %v1686_v30 = vpop.permute.xlu0 %1685  ;;  %v934_v23 = vld [vmem:[#allocation12 + $0x38] sm:$0xff]  ;;  %v936_v24 = vld [vmem:[#allocation12 + $0x48] sm:$0xff]  ;;  %v935_v25 = vld [vmem:[#allocation12 + $0x40] sm:$0xff] }
 0x2dc   : > { %v1688_v31 = vunpack.i.h.bf16 %v1686_v30  ;;  %v1687_v32 = vunpack.i.l.bf16 %v1686_v30  ;;  %v942_v30 = vld [vmem:[#allocation12 + $0x78] sm:$0xff] }
 0x2dd   : > { %v818_v33 = vsel %vm816_vm10, %v1692_v29, %v1693_v28  ;;  %1498 = vmatpush1.bf16.msk.msra.mxu1 %vm2476_vm11, %v1496_v27  ;;  %v937_v27 = vld [vmem:[#allocation12 + $0x50] sm:$0xff]  ;;  %v940_v28 = vld [vmem:[#allocation12 + $0x68] sm:$0xff]  ;;  %v939_v29 = vld [vmem:[#allocation12 + $0x60] sm:$0xff] }
 0x2de   : > { %v817_v34 = vsel %vm816_vm10, %v1687_v32, %v1688_v31  ;;  %v1701_v35 = vpop.permute.xlu1 %1700  ;;  %1499 = vmatprep.subr.bf16.mxu1 %v2041_v39  ;;  %v941_v31 = vld [vmem:[#allocation12 + $0x70] sm:$0xff] }
 0x2df   : > { %v1500_v36 = vpack.c.bf16 %v818_v33, %v817_v34  ;;  %v1703_v37 = vunpack.i.h.bf16 %v1701_v35  ;;  %v1702_v38 = vunpack.i.l.bf16 %v1701_v35  ;;  %v1696_v40 = vpop.permute.xlu0 %1695 }
 0x2e0   : > { %v1698_v41 = vunpack.i.h.bf16 %v1696_v40  ;;  %v1697_v42 = vunpack.i.l.bf16 %v1696_v40 }
 0x2e1   : > { %1502 = vmatpush1.bf16.msk.msra.mxu1 %vm2466_vm7, %v1500_v36  ;;  %v847_v44 = vsel %vm845_vm12, %v1702_v38, %v1703_v37 }
 0x2e2   : > { %v1711_v43 = vpop.permute.xlu1 %1710  ;;  %1503 = vmatprep.subr.bf16.mxu1 %v2041_v39  ;;  %v846_v45 = vsel %vm845_vm12, %v1697_v42, %v1698_v41 }
 0x2e3   : > { %v1706_v46 = vpop.permute.xlu0 %1705  ;;  %v1713_v48 = vunpack.i.h.bf16 %v1711_v43  ;;  %v1712_v49 = vunpack.i.l.bf16 %v1711_v43  ;;  %v1507_v53 = vpack.c.bf16 %v847_v44, %v846_v45 }
 0x2e4   : > { %v1708_v50 = vunpack.i.h.bf16 %v1706_v46  ;;  %v1707_v51 = vunpack.i.l.bf16 %v1706_v46 }
 0x2e5   : > { %1505 = vmatpush1.bf16.msra.mxu1 %v1504_v47  ;;  %v872_v57 = vsel %vm870_vm13, %v1712_v49, %v1713_v48 }
 0x2e6   : > { %v1721_v52 = vpop.permute.xlu1 %1720  ;;  %1506 = vmatprep.subr.bf16.mxu1 %v2041_v39  ;;  %v871_v58 = vsel %vm870_vm13, %v1707_v51, %v1708_v50 }
 0x2e7   : > { %v1723_v54 = vunpack.i.h.bf16 %v1721_v52  ;;  %v1722_v55 = vunpack.i.l.bf16 %v1721_v52  ;;  %v1716_v56 = vpop.permute.xlu0 %1715  ;;  %v1511_v0 = vpack.c.bf16 %v872_v57, %v871_v58 }
 0x2e8   : > { %v1718_v59 = vunpack.i.h.bf16 %v1716_v56  ;;  %v1717_v60 = vunpack.i.l.bf16 %v1716_v56 }
 0x2e9   : > { %1509 = vmatpush1.bf16.msk.msra.mxu1 %vm2476_vm11, %v1507_v53  ;;  %v897_v6 = vsel %vm895_vm14, %v1722_v55, %v1723_v54 }
 0x2ea   : > { %v1731_v63 = vpop.permute.xlu1 %1730  ;;  %1510 = vmatprep.subr.bf16.mxu1 %v2041_v39  ;;  %v896_v4 = vsel %vm895_vm14, %v1717_v60, %v1718_v59 }
 0x2eb   : > { %v1726_v62 = vpop.permute.xlu0 %1725  ;;  %v1733_v9 = vunpack.i.h.bf16 %v1731_v63  ;;  %v1732_v10 = vunpack.i.l.bf16 %v1731_v63  ;;  %v1515_v15 = vpack.c.bf16 %v897_v6, %v896_v4 }
 0x2ec   : > { %v1728_v13 = vunpack.i.h.bf16 %v1726_v62  ;;  %v1727_v14 = vunpack.i.l.bf16 %v1726_v62 }
 0x2ed   : > { %1513 = vmatpush1.bf16.msk.msra.mxu1 %vm2466_vm7, %v1511_v0  ;;  %v920_v16 = vsel %vm918_vm15, %v1732_v10, %v1733_v9 }
 0x2ee   : > { %1514 = vmatprep.subr.bf16.mxu1 %v2041_v39  ;;  %v919_v17 = vsel %vm918_vm15, %v1727_v14, %v1728_v13 }
 0x2ef   : > { %v1518_v18 = vpack.c.bf16 %v920_v16, %v919_v17 }
 0x2f1   : > { %1516 = vmatpush1.bf16.msra.mxu1 %v1515_v15 }
 0x2f2   : > { %1517 = vmatprep.subr.bf16.mxu1 %v2041_v39  ;;  %v933_v39 = vld [vmem:[#allocation12 + $0x30] sm:$0xff] }
 0x2f5   : > { %1520 = vmatpush1.bf16.msk.msra.mxu1 %vm2476_vm11, %v1518_v18 }
 0x2f8   : > { %1050 = vmatmul.mubr.f32.vlgmr.msra.gmra.mrb[0].mxu1 %v927_v19 }
 0x2f9   : > { %1329 = vmatprep.mubr.msk.f32.mxu1 %vm705_vm3, %v930_v20 }
 0x2fc   : > { %1055 = vmatmul.mubr.f32.gmra.mrb[2].mxu1 %v929_v21 }
 0x2fd   : > { %1330 = vmatprep.mubr.msk.f32.mxu1 %vm705_vm3, %v932_v61 }
 0x300   : > { %1060 = vmatmul.mubr.f32.gmra.mrb[4].mxu1 %v931_v22 }
 0x301   : > { %1331 = vmatprep.mubr.msk.f32.mxu1 %vm705_vm3, %v934_v23 }
 0x304   : > { %1065 = vmatmul.mubr.f32.gmra.mrb[6].mxu1 %v933_v39 }
 0x305   : > { %1332 = vmatprep.mubr.msk.f32.mxu1 %vm705_vm3, %v936_v24 }
 0x308   : > { %1070 = vmatmul.mubr.f32.gmra.mrb[8].mxu1 %v935_v25 }
 0x309   : > { %1333 = vmatprep.mubr.msk.f32.mxu1 %vm705_vm3, %v938_v26 }
 0x30c   : > { %1075 = vmatmul.mubr.f32.gmra.mrb[10].mxu1 %v937_v27 }
 0x30d   : > { %1334 = vmatprep.mubr.msk.f32.mxu1 %vm705_vm3, %v940_v28 }
 0x310   : > { %1080 = vmatmul.mubr.f32.gmra.mrb[12].mxu1 %v939_v29 }
 0x311   : > { %1335 = vmatprep.mubr.msk.f32.mxu1 %vm705_vm3, %v942_v30 }
 0x314   : > { %1085 = vmatmul.mubr.f32.gmra.mrb[14].mxu1 %v941_v31 }
 0x3cb   : > { %v1051_v32 = vpop.f32.mrb[0].mxu1 }
 0x3cc   : > { %1758 = vtanh.f32 %v1051_v32  ;;  %v1053_v33 = vpop.f32.mrb[1].mxu1 }
 0x3cf   : > { %v1056_v34 = vpop.f32.mrb[2].mxu1 }
 0x3d0   : > { %1760 = vtanh.f32 %v1056_v34  ;;  %v1058_v35 = vpop.f32.mrb[3].mxu1 }
 0x3d3   : > { %v1061_v36 = vpop.f32.mrb[4].mxu1 }
 0x3d4   : > { %1762 = vtanh.f32 %v1061_v36  ;;  %v1063_v37 = vpop.f32.mrb[5].mxu1 }
 0x3d6   : > { %v1759_v38 = vpop.eup %1758 }
 0x3d7   : > { %v1106_v40 = vadd.f32 1.0, %v1759_v38  ;;  %v1066_v41 = vpop.f32.mrb[6].mxu1 }
 0x3d8   : > { %1764 = vtanh.f32 %v1066_v41  ;;  %v1068_v42 = vpop.f32.mrb[7].mxu1 }
 0x3d9   : > { %v1114_v43 = vmul.f32 %v1106_v40, %v2395_v1 }
 0x3da   : > { %v1761_v44 = vpop.eup %1760 }
 0x3db   : > { %1122 = vst [vmem:[%s2508_s2] sm:$0xff] %v1114_v43  ;;  %v1107_v45 = vadd.f32 1.0, %v1761_v44  ;;  %v1071_v46 = vpop.f32.mrb[8].mxu1 }
 0x3dc   : > { %1766 = vtanh.f32 %v1071_v46  ;;  %v1073_v47 = vpop.f32.mrb[9].mxu1 }
 0x3dd   : > { %v1115_v48 = vmul.f32 %v1107_v45, %v2398_v2 }
 0x3de   : > { %v1763_v49 = vpop.eup %1762 }
 0x3df   : > { %1123 = vst [vmem:[%s2508_s2 + $0x8] sm:$0xff] %v1115_v48  ;;  %v1108_v50 = vadd.f32 1.0, %v1763_v49  ;;  %v1076_v51 = vpop.f32.mrb[10].mxu1 }
 0x3e0   : > { %1768 = vtanh.f32 %v1076_v51  ;;  %v1078_v1 = vpop.f32.mrb[11].mxu1 }
 0x3e1   : > { %v1116_v52 = vmul.f32 %v1108_v50, %v2401_v3 }
 0x3e2   : > { %v1765_v53 = vpop.eup %1764 }
 0x3e3   : > { %1124 = vst [vmem:[%s2508_s2 + $0x10] sm:$0xff] %v1116_v52  ;;  %v1109_v54 = vadd.f32 1.0, %v1765_v53  ;;  %v1081_v55 = vpop.f32.mrb[12].mxu1 }
 0x3e4   : > { %1770 = vtanh.f32 %v1081_v55  ;;  %v1083_v56 = vpop.f32.mrb[13].mxu1 }
 0x3e5   : > { %v1117_v2 = vmul.f32 %v1109_v54, %v2406_v5 }
 0x3e6   : > { %v1767_v57 = vpop.eup %1766 }
 0x3e7   : > { %1125 = vst [vmem:[%s2508_s2 + $0x18] sm:$0xff] %v1117_v2  ;;  %v1110_v58 = vadd.f32 1.0, %v1767_v57  ;;  %v1086_v59 = vpop.f32.mrb[14].mxu1 }
 0x3e8   : > { %1772 = vtanh.f32 %v1086_v59  ;;  %v1088_v60 = vpop.f32.mrb[15].mxu1 }
 0x3e9   : > { %v1118_v3 = vmul.f32 %v1110_v58, %v2411_v7 }
 0x3ea   : > { %v1769_v63 = vpop.eup %1768 }
 0x3eb   : > { %1126 = vst [vmem:[%s2508_s2 + $0x20] sm:$0xff] %v1118_v3  ;;  %v1111_v0 = vadd.f32 1.0, %v1769_v63 }
 0x3ed   : > { %v1119_v62 = vmul.f32 %v1111_v0, %v2414_v8 }
 0x3ee   : > { %v1771_v4 = vpop.eup %1770 }
 0x3ef   : > { %1127 = vst [vmem:[%s2508_s2 + $0x28] sm:$0xff] %v1119_v62  ;;  %v1112_v5 = vadd.f32 1.0, %v1771_v4 }
 0x3f1   : > { %v1120_v6 = vmul.f32 %v1112_v5, %v2420_v11 }
 0x3f2   : > { %v1773_v9 = vpop.eup %1772 }
 0x3f3   : > { %1128 = vst [vmem:[%s2508_s2 + $0x30] sm:$0xff] %v1120_v6  ;;  %v1113_v7 = vadd.f32 1.0, %v1773_v9 }
 0x3f5   : > { %v1121_v8 = vmul.f32 %v1113_v7, %v2423_v12 }
 0x3f7   : > { %1129 = vst [vmem:[%s2508_s2 + $0x38] sm:$0xff] %v1121_v8 }
 0x3f8   : > { %1931 = shalt.err (!%p1928_p5)
}
 0x3f9   : > { %s1932_s11 = scalar_lea.hbm %s2531_s17, 1024  ;;  %s1936_s29 = scalar_lea.hbm %s2648_s16, 4096 }
 0x3fa   : > { %p1933_p8 = scmp.ne.s32.totalorder %s2531_s17, %s1932_s11  ;;  %p1937_p6 = scmp.lt.u32.totalorder %s2531_s17, %s2648_s16 }
 0x3fb   : > { %p1938_p10 = scmp.lt.u32.totalorder %s1936_s29, %s1932_s11  ;;  %p1940_p0 = scmp.lt.u32.totalorder %s1932_s11, %s2531_s17 }
 0x3fc   : > { %p1934_p12 = pnand %p1933_p8, %p2649_p4 }
 0x3fd   : > { %p1939_p13 = por %p1938_p10, %p1937_p6 }
 0x3fe   : > { %p1935_p2 = pneg %p1934_p12 }
 0x3ff   : > { %p1941_p1 = por %p1940_p0, %p1939_p13 }
 0x401   : > { %p1942_p11 = pnand %p1941_p1, %p1935_p2 }
 0x403   : > { %1945 = shalt.err (!%p1942_p11)
}
 0x404   : > { %s2050_s3 = smov 128   ;;  %s2051_s2 = smov 256  }
 0x405   : > { %s2052_s4 = smov 8  }
 0x406   : > { %1537 = dma.vmem_to_hbm [thread:$0]  (%p2649_p4), %s2525_s28, 1024, %s2531_s17, %s1131_s21, %s2050_s3, %s2051_s2, %s2052_s4  }
 0x407 PF: > { %s2650_s18 = sld [smem:[#allocation19_spill]]  ;;  %s2651_s12 = sld [smem:[#allocation23_spill]] }
 0x408   : > { %p1567_p3 = scmp.ge.s32.totalorder %s2028_s25, 2 }
 0x40d   : > { %s1160_s27 = sand.u32 1, %s2650_s18   ;;  %p2652_p7 = scmp.ne.s32.totalorder %s2651_s12, 0 }
 0x40e   : > { %s1161_s14 = scalar_lea.sflag [#allocation6], %s1160_s27 }
 0x40f   : > { %p1557_p9 = pnand %p1567_p3, %p2652_p7 }
 0x411   : > { %1995 = dma.done.wait (!%p1557_p9), %s1161_s14, 1024  }
 0x412   : > { %1997 = vsyncadd (!%p1557_p9), %s1161_s14, 4294966272  ;;  %s25_s25 = sadd.s32 1, %s2028_s25   ;;  %s2653_s10 = sld [smem:[#allocation24_spill]] }
 0x413   : > { %p22_p5 = scmp.ge.s32.totalorder %s25_s25, 6   ;;  %s2654_s7 = sld [smem:[#allocation25_spill]] }
 0x414   : > { %s2655_s18 = smov %s2004_s19  ;;  %s2656_s19 = smov %s2008_s20 }
 0x415   : > { %s2657_s20 = smov %s2320_s15  ;;  %s2658_s21 = smov %s2020_s23 }
 0x416   : > { %s2659_s22 = smov %s2024_s24  ;;  %24 = sbr.rel (!%p22_p5) target bundleno = 16 (0x10), region = 111 }
 0x418   : > { %s2660_s23 = smov %s2653_s10 }
 0x419   : > { %s2661_s24 = smov %s2654_s7 }
 0x41d   :  { %1166 = vsyncpa [#allocation5], 1 }
 0x41e   :  { %1168 = vsyncpa [#allocation5 + $0x1], 1 }
 0x41f   :  { %1169 = vsyncpa [#allocation8], 1 }
 0x420   :  { %1171 = vsyncpa [#allocation8 + $0x1], 1 }
 0x421   :  { %1172 = vsyncpa [#allocation11], 1 }
 0x422   :  { %1173 = vsyncpa [#allocation6], 1 }
 0x423   :  { %1175 = vsyncpa [#allocation6 + $0x1], 1 }

</bundles_post_ra>
